<compile_context>
chip_gen: v5e
topology: v5e:2x2
jax: 0.10.0
libtpu: 0.0.40
codegen_flags: <defaults>
</compile_context>

<pallas_src>
import jax
import jax.numpy as jnp
from jax import lax
from jax.experimental import pallas as pl
from jax.experimental.pallas import tpu as pltpu

# ---- Module hyper-parameters (ActivityCNN defaults) -------------------------
SEQ_LEN = 90
IN_CH = 6
HIDDEN_CH = 20
OUT_CH = 6

STRIDE1 = SEQ_LEN // 15          # 6
K1 = STRIDE1                     # 6  (kernel == stride -> non-overlapping)
K = 3                            # kernel size of conv2/3/4

L1 = (SEQ_LEN - K1) // STRIDE1 + 1   # 15
L2 = (L1 - K) // 2 + 1               # 7
L3 = (L2 - K) // 2 + 1               # 3
L4 = (L3 - K) // 2 + 1               # 1

# Channel slab: HIDDEN_CH (20) padded to 32 rows so every scratch slab and
# every stacked 3-tap window slice is vreg-aligned for both f32 (8-row vregs)
# and bf16 (16-row packed vregs).  Padded channels are exactly zero.
CP = 32


# ---- Kernel ------------------------------------------------------------------
def activity_cnn_kernel(x_ref, w1_ref, b1_ref, w2_ref, b2_ref,
                        w3_ref, b3_ref, w4_ref, b4_ref,
                        out_ref, h1_ref, h2_ref, h3_ref):
    bn = out_ref.shape[-1]
    f32 = jnp.float32

    w1 = w1_ref[...]            # (CP, IN_CH*K1)
    w2 = w2_ref[...]            # (CP, K*CP)   3 taps stacked along K
    w3 = w3_ref[...]            # (CP, K*CP)
    w4 = w4_ref[...]            # (OUT_CH, K*CP)
    cdt = w1.dtype              # MXU operand / scratch dtype (f32 or bf16)

    # Lane-broadcast biases once (JAX does not CSE broadcast_in_dim); keep the
    # bias adds / ReLU in f32 (v5e VPU has no bf16).
    b1 = jnp.broadcast_to(b1_ref[...], (CP, bn))
    b2 = jnp.broadcast_to(b2_ref[...], (CP, bn))
    b3 = jnp.broadcast_to(b3_ref[...], (CP, bn))
    b4 = jnp.broadcast_to(b4_ref[...], (OUT_CH, bn))

    # conv1 + ReLU: stride == kernel (non-overlapping windows, im2col'd in the
    # wrapper) -> one (CP,36)x(36,bn) matmul per output position, batch on the
    # lane axis.  Each result slab is cast once to the operand dtype and stored
    # lane-dense / sublane-aligned into the position-major h1 scratch.
    for t in range(L1):
        y = jnp.dot(w1, x_ref[t], preferred_element_type=f32) + b1
        h1_ref[pl.ds(t * CP, CP), :] = jnp.maximum(y, 0.0).astype(cdt)

    def conv_k3_s2(src_ref, dst_ref, w, b):
        # kernel=3 / stride=2 'valid' conv.  Source scratch is position-major
        # with CP-row slabs, so the 3 taps of each output window are ONE
        # contiguous, vreg-aligned (K*CP, bn) slice -> a single K=96 matmul per
        # output position (no per-tap dots, no accumulator adds).
        n_out = dst_ref.shape[0] // CP
        for t in range(n_out):
            win = src_ref[pl.ds(2 * t * CP, K * CP), :]
            y = jnp.dot(w, win, preferred_element_type=f32) + b
            dst_ref[pl.ds(t * CP, CP), :] = jnp.maximum(y, 0.0).astype(cdt)

    conv_k3_s2(h1_ref, h2_ref, w2, b2)    # conv2 + ReLU (dropout = identity)
    conv_k3_s2(h2_ref, h3_ref, w3, b3)    # conv3 + ReLU

    # conv4 (no ReLU): h3 holds exactly L3 == K positions, i.e. the single
    # conv4 window -> one matmul, then one lane-dense store of the output.
    y4 = jnp.dot(w4, h3_ref[...], preferred_element_type=f32) + b4
    out_ref[...] = y4.astype(out_ref.dtype)


# ---- Wrapper -----------------------------------------------------------------
def activity_cnn_forward(x_ncl, params, *, block_n=1024,
                         operand_dtype=jnp.bfloat16):
    """ActivityCNN forward.  x_ncl: (N, IN_CH, SEQ_LEN) float32 (PyTorch
    Conv1d layout).  Returns (N, OUT_CH, 1) float32.

    operand_dtype=bf16 (default) is the MXU-native fast path on v6e/v7x with
    f32 accumulation and f32 bias/ReLU; it also halves the input DMA (this
    kernel is HBM-DMA bound).  Pass jnp.float32 for exact parity with an f32
    reference.  Call under jax.jit so the im2col/transpose/pad/cast below fuse
    into a single HBM layout pass.  block_n: sweep 1024-4096 (cap ~2048 for
    f32 on v7x or raise vmem_limit_bytes).
    """
    n = x_ncl.shape[0]
    (w1, b1), (w2, b2), (w3, b3), (w4, b4) = params

    # ---- batch tiling: batch lives on the 128-lane axis ----------------------
    n_pad128 = pl.cdiv(n, 128) * 128
    bn = max(128, (min(block_n, n_pad128) // 128) * 128)
    # v7x megacore: keep >=2 grid steps when the batch allows it so
    # dimension_semantics=("parallel",) actually uses both TensorCores.
    if n_pad128 // bn < 2 and n_pad128 >= 256:
        bn = ((n_pad128 // 2) // 128) * 128
    n_pad = pl.cdiv(n_pad128, bn) * bn
    grid = (n_pad // bn,)

    # ---- input: conv1 im2col (stride == kernel -> pure reshape) fused with
    # the NCL -> (position, feature, batch) transpose, lane padding and the
    # operand-dtype cast; under jit this is one layout pass over x.
    x_k = x_ncl.reshape(n, IN_CH, L1, K1)
    x_k = jnp.transpose(x_k, (2, 1, 3, 0)).reshape(L1, IN_CH * K1, n)
    x_k = x_k.astype(operand_dtype)
    if n_pad != n:
        x_k = jnp.pad(x_k, ((0, 0), (0, 0), (0, n_pad - n)))

    # ---- weights: torch (c_out, c_in, k) -> lane/sublane-friendly packs.
    w1_p = jnp.zeros((CP, IN_CH * K1), jnp.float32)
    w1_p = w1_p.at[:HIDDEN_CH, :].set(w1.reshape(HIDDEN_CH, IN_CH * K1))
    w1_p = w1_p.astype(operand_dtype)

    def stack_taps(w, out_rows):
        # (c_out, c_in, k) -> (out_rows, K*CP); column k*CP + c_in matches the
        # position-major, CP-padded activation scratch layout.
        c_out, c_in, k = w.shape
        ws = jnp.zeros((out_rows, k * CP), jnp.float32)
        for kk in range(k):
            ws = ws.at[:c_out, kk * CP: kk * CP + c_in].set(w[:, :, kk])
        return ws.astype(operand_dtype)

    def pad_bias(b, rows):
        return jnp.zeros((rows, 1), jnp.float32).at[:b.shape[0], 0].set(b)

    w2_p, w3_p = stack_taps(w2, CP), stack_taps(w3, CP)
    w4_p = stack_taps(w4, OUT_CH)
    b1_p, b2_p, b3_p = pad_bias(b1, CP), pad_bias(b2, CP), pad_bias(b3, CP)
    b4_p = pad_bias(b4, OUT_CH)

    # VMEM per grid step at bn=1024, bf16 operands: ~2 x 1.1 MiB double-buffered
    # input + ~1.6 MiB activation scratch + weights ~= 4 MiB (f32: ~8 MiB) --
    # well inside the 32 MiB scoped default on all generations, including
    # v7x's 64 MiB physical VMEM.
    out_k = pl.pallas_call(
        activity_cnn_kernel,
        out_shape=jax.ShapeDtypeStruct((OUT_CH, n_pad), jnp.float32),
        grid_spec=pltpu.PrefetchScalarGridSpec(
            num_scalar_prefetch=0,
            grid=grid,
            in_specs=[
                pl.BlockSpec((L1, IN_CH * K1, bn), lambda i: (0, 0, i)),  # x
                pl.BlockSpec((CP, IN_CH * K1), lambda i: (0, 0)),         # w1
                pl.BlockSpec((CP, 1), lambda i: (0, 0)),                  # b1
                pl.BlockSpec((CP, K * CP), lambda i: (0, 0)),             # w2
                pl.BlockSpec((CP, 1), lambda i: (0, 0)),                  # b2
                pl.BlockSpec((CP, K * CP), lambda i: (0, 0)),             # w3
                pl.BlockSpec((CP, 1), lambda i: (0, 0)),                  # b3
                pl.BlockSpec((OUT_CH, K * CP), lambda i: (0, 0)),         # w4
                pl.BlockSpec((OUT_CH, 1), lambda i: (0, 0)),              # b4
            ],
            out_specs=pl.BlockSpec((OUT_CH, bn), lambda i: (0, i)),
            scratch_shapes=[
                pltpu.VMEM((L1 * CP, bn), operand_dtype),   # conv1 activations
                pltpu.VMEM((L2 * CP, bn), operand_dtype),   # conv2 activations
                pltpu.VMEM((L3 * CP, bn), operand_dtype),   # conv3 activations
            ]),
        compiler_params=pltpu.CompilerParams(
            dimension_semantics=("parallel",)),   # megacore sharding on v7x
    )(x_k, w1_p, b1_p, w2_p, b2_p, w3_p, b3_p, w4_p, b4_p)

    # Drop batch padding; back to the PyTorch (N, OUT_CH, L_out=1) layout
    # (tiny: 6 values per sample).
    return jnp.transpose(out_k[:, :n], (1, 0))[:, :, None]


# ---- Deterministic parameter init (PyTorch Conv1d-style uniform bounds) -------
def init_params(key):
    def conv_init(k, c_out, c_in, ksize):
        bound = 1.0 / float(c_in * ksize) ** 0.5
        kw, kb = jax.random.split(k)
        w = jax.random.uniform(kw, (c_out, c_in, ksize), jnp.float32, -bound, bound)
        b = jax.random.uniform(kb, (c_out,), jnp.float32, -bound, bound)
        return w, b

    k1, k2, k3, k4 = jax.random.split(key, 4)
    return (conv_init(k1, HIDDEN_CH, IN_CH, K1),
            conv_init(k2, HIDDEN_CH, HIDDEN_CH, K),
            conv_init(k3, HIDDEN_CH, HIDDEN_CH, K),
            conv_init(k4, OUT_CH, HIDDEN_CH, K))


# ---- Pure-JAX reference (for correctness check) --------------------------------
def _conv_ref(x, w, b, stride):
    y = lax.conv_general_dilated(x, w, window_strides=(stride,), padding='VALID',
                                 dimension_numbers=('NCH', 'OIH', 'NCH'))
    return y + b[None, :, None]


def activity_cnn_ref(x, params):
    (w1, b1), (w2, b2), (w3, b3), (w4, b4) = params
    h = jnp.maximum(_conv_ref(x, w1, b1, STRIDE1), 0.0)
    h = jnp.maximum(_conv_ref(h, w2, b2, 2), 0.0)
    h = jnp.maximum(_conv_ref(h, w3, b3, 2), 0.0)
    return _conv_ref(h, w4, b4, 2)


if __name__ == "__main__":
    root = jax.random.PRNGKey(0)
    kx, kp = jax.random.split(root)

    batch = 2
    x = jax.random.normal(kx, (batch, IN_CH, SEQ_LEN), dtype=jnp.float32)
    params = init_params(kp)

    fwd = jax.jit(activity_cnn_forward,
                  static_argnames=("block_n", "operand_dtype"))

    ref = jax.block_until_ready(activity_cnn_ref(x, params))

    # Exact-parity path (f32 MXU operands).
    out_f32 = jax.block_until_ready(fwd(x, params, operand_dtype=jnp.float32))
    assert out_f32.shape == (batch, OUT_CH, L4), out_f32.shape
    assert jnp.allclose(out_f32, ref, atol=1e-3, rtol=1e-3), "f32 mismatch vs reference"

    # Default fast path (bf16 MXU operands, f32 accumulation) -- looser tolerance.
    out_bf16 = jax.block_until_ready(fwd(x, params))
    assert out_bf16.shape == (batch, OUT_CH, L4), out_bf16.shape
    assert jnp.allclose(out_bf16, ref, atol=1e-1, rtol=1e-1), "bf16 mismatch vs reference"

    print("KERNEL_OK")
</pallas_src>

<mosaic_0001>
module attributes {stable_mosaic.version = 11 : i64} {
  func.func @activity_cnn_kernel(%arg0: i32, %arg1: memref<15x36x128xf32, #tpu.memory_space<vmem>>, %arg2: memref<32x36xf32, #tpu.memory_space<vmem>>, %arg3: memref<32x1xf32, #tpu.memory_space<vmem>>, %arg4: memref<32x96xf32, #tpu.memory_space<vmem>>, %arg5: memref<32x1xf32, #tpu.memory_space<vmem>>, %arg6: memref<32x96xf32, #tpu.memory_space<vmem>>, %arg7: memref<32x1xf32, #tpu.memory_space<vmem>>, %arg8: memref<6x96xf32, #tpu.memory_space<vmem>>, %arg9: memref<6x1xf32, #tpu.memory_space<vmem>>, %arg10: memref<6x128xf32, #tpu.memory_space<vmem>>, %arg11: memref<480x128xf32, #tpu.memory_space<vmem>>, %arg12: memref<224x128xf32, #tpu.memory_space<vmem>>, %arg13: memref<96x128xf32, #tpu.memory_space<vmem>>) attributes {dimension_semantics = [#tpu.dimension_semantics<parallel>], iteration_bounds = array<i64: 1>, scalar_prefetch = 0 : i64, scratch_operands = 3 : i64, tpu.core_type = #tpu.core_type<tc>, window_params = [{transform_indices = @transform_0, window_bounds = array<i64: 15, 36, 128>}, {pipeline_mode = #tpu.pipeline_mode<synchronous>, transform_indices = @transform_1, window_bounds = array<i64: 32, 36>}, {pipeline_mode = #tpu.pipeline_mode<synchronous>, transform_indices = @transform_2, window_bounds = array<i64: 32, 1>}, {pipeline_mode = #tpu.pipeline_mode<synchronous>, transform_indices = @transform_3, window_bounds = array<i64: 32, 96>}, {pipeline_mode = #tpu.pipeline_mode<synchronous>, transform_indices = @transform_4, window_bounds = array<i64: 32, 1>}, {pipeline_mode = #tpu.pipeline_mode<synchronous>, transform_indices = @transform_5, window_bounds = array<i64: 32, 96>}, {pipeline_mode = #tpu.pipeline_mode<synchronous>, transform_indices = @transform_6, window_bounds = array<i64: 32, 1>}, {pipeline_mode = #tpu.pipeline_mode<synchronous>, transform_indices = @transform_7, window_bounds = array<i64: 6, 96>}, {pipeline_mode = #tpu.pipeline_mode<synchronous>, transform_indices = @transform_8, window_bounds = array<i64: 6, 1>}, {transform_indices = @transform_9, window_bounds = array<i64: 6, 128>}]} {
    %c0 = arith.constant 0 : index
    %c0_0 = arith.constant 0 : index
    %0 = vector.load %arg2[%c0, %c0_0] : memref<32x36xf32, #tpu.memory_space<vmem>>, vector<32x36xf32>
    %c0_1 = arith.constant 0 : index
    %c0_2 = arith.constant 0 : index
    %1 = vector.load %arg4[%c0_1, %c0_2] : memref<32x96xf32, #tpu.memory_space<vmem>>, vector<32x96xf32>
    %c0_3 = arith.constant 0 : index
    %c0_4 = arith.constant 0 : index
    %2 = vector.load %arg6[%c0_3, %c0_4] : memref<32x96xf32, #tpu.memory_space<vmem>>, vector<32x96xf32>
    %c0_5 = arith.constant 0 : index
    %c0_6 = arith.constant 0 : index
    %3 = vector.load %arg8[%c0_5, %c0_6] : memref<6x96xf32, #tpu.memory_space<vmem>>, vector<6x96xf32>
    %c0_7 = arith.constant 0 : index
    %c0_8 = arith.constant 0 : index
    %4 = vector.load %arg3[%c0_7, %c0_8] : memref<32x1xf32, #tpu.memory_space<vmem>>, vector<32x1xf32>
    %5 = vector.shape_cast %4 : vector<32x1xf32> to vector<32x1xf32>
    %6 = vector.broadcast %5 : vector<32x1xf32> to vector<32x128xf32>
    %c0_9 = arith.constant 0 : index
    %c0_10 = arith.constant 0 : index
    %7 = vector.load %arg5[%c0_9, %c0_10] : memref<32x1xf32, #tpu.memory_space<vmem>>, vector<32x1xf32>
    %8 = vector.shape_cast %7 : vector<32x1xf32> to vector<32x1xf32>
    %9 = vector.broadcast %8 : vector<32x1xf32> to vector<32x128xf32>
    %c0_11 = arith.constant 0 : index
    %c0_12 = arith.constant 0 : index
    %10 = vector.load %arg7[%c0_11, %c0_12] : memref<32x1xf32, #tpu.memory_space<vmem>>, vector<32x1xf32>
    %11 = vector.shape_cast %10 : vector<32x1xf32> to vector<32x1xf32>
    %12 = vector.broadcast %11 : vector<32x1xf32> to vector<32x128xf32>
    %c0_13 = arith.constant 0 : index
    %c0_14 = arith.constant 0 : index
    %13 = vector.load %arg9[%c0_13, %c0_14] : memref<6x1xf32, #tpu.memory_space<vmem>>, vector<6x1xf32>
    %14 = vector.shape_cast %13 : vector<6x1xf32> to vector<6x1xf32>
    %15 = vector.broadcast %14 : vector<6x1xf32> to vector<6x128xf32>
    %c0_15 = arith.constant 0 : index
    %c0_16 = arith.constant 0 : index
    %c0_17 = arith.constant 0 : index
    %16 = vector.load %arg1[%c0_15, %c0_16, %c0_17] : memref<15x36x128xf32, #tpu.memory_space<vmem>>, vector<1x36x128xf32>
    %17 = vector.shape_cast %16 : vector<1x36x128xf32> to vector<36x128xf32>
    %cst = arith.constant dense<0.000000e+00> : vector<32x128xf32>
    %18 = tpu.matmul %0, %17, %cst {dimension_numbers = #tpu.dot_dimension_numbers<[1], [0], [0], [1], [0, 0, 1, 1], [], []>} : vector<32x36xf32>, vector<36x128xf32>, vector<32x128xf32> -> vector<32x128xf32>
    %19 = arith.addf %18, %6 : vector<32x128xf32>
    %cst_18 = arith.constant 0.000000e+00 : f32
    %20 = vector.broadcast %cst_18 : f32 to vector<32x128xf32>
    %21 = arith.maximumf %19, %20 : vector<32x128xf32>
    %c0_19 = arith.constant 0 : index
    %c0_20 = arith.constant 0 : index
    %22 = vector.load %arg11[%c0_19, %c0_20] : memref<480x128xf32, #tpu.memory_space<vmem>>, vector<32x128xf32>
    tpu.vector_store %arg11[%c0_19, %c0_20], %21 {strides = array<i32>} : memref<480x128xf32, #tpu.memory_space<vmem>>, vector<32x128xf32>,
    %c1 = arith.constant 1 : index
    %c0_21 = arith.constant 0 : index
    %c0_22 = arith.constant 0 : index
    %23 = vector.load %arg1[%c1, %c0_21, %c0_22] : memref<15x36x128xf32, #tpu.memory_space<vmem>>, vector<1x36x128xf32>
    %24 = vector.shape_cast %23 : vector<1x36x128xf32> to vector<36x128xf32>
    %cst_23 = arith.constant dense<0.000000e+00> : vector<32x128xf32>
    %25 = tpu.matmul %0, %24, %cst_23 {dimension_numbers = #tpu.dot_dimension_numbers<[1], [0], [0], [1], [0, 0, 1, 1], [], []>} : vector<32x36xf32>, vector<36x128xf32>, vector<32x128xf32> -> vector<32x128xf32>
    %26 = arith.addf %25, %6 : vector<32x128xf32>
    %cst_24 = arith.constant 0.000000e+00 : f32
    %27 = vector.broadcast %cst_24 : f32 to vector<32x128xf32>
    %28 = arith.maximumf %26, %27 : vector<32x128xf32>
    %c32 = arith.constant 32 : index
    %c0_25 = arith.constant 0 : index
    %29 = vector.load %arg11[%c32, %c0_25] : memref<480x128xf32, #tpu.memory_space<vmem>>, vector<32x128xf32>
    tpu.vector_store %arg11[%c32, %c0_25], %28 {strides = array<i32>} : memref<480x128xf32, #tpu.memory_space<vmem>>, vector<32x128xf32>,
    %c2 = arith.constant 2 : index
    %c0_26 = arith.constant 0 : index
    %c0_27 = arith.constant 0 : index
    %30 = vector.load %arg1[%c2, %c0_26, %c0_27] : memref<15x36x128xf32, #tpu.memory_space<vmem>>, vector<1x36x128xf32>
    %31 = vector.shape_cast %30 : vector<1x36x128xf32> to vector<36x128xf32>
    %cst_28 = arith.constant dense<0.000000e+00> : vector<32x128xf32>
    %32 = tpu.matmul %0, %31, %cst_28 {dimension_numbers = #tpu.dot_dimension_numbers<[1], [0], [0], [1], [0, 0, 1, 1], [], []>} : vector<32x36xf32>, vector<36x128xf32>, vector<32x128xf32> -> vector<32x128xf32>
    %33 = arith.addf %32, %6 : vector<32x128xf32>
    %cst_29 = arith.constant 0.000000e+00 : f32
    %34 = vector.broadcast %cst_29 : f32 to vector<32x128xf32>
    %35 = arith.maximumf %33, %34 : vector<32x128xf32>
    %c64 = arith.constant 64 : index
    %c0_30 = arith.constant 0 : index
    %36 = vector.load %arg11[%c64, %c0_30] : memref<480x128xf32, #tpu.memory_space<vmem>>, vector<32x128xf32>
    tpu.vector_store %arg11[%c64, %c0_30], %35 {strides = array<i32>} : memref<480x128xf32, #tpu.memory_space<vmem>>, vector<32x128xf32>,
    %c3 = arith.constant 3 : index
    %c0_31 = arith.constant 0 : index
    %c0_32 = arith.constant 0 : index
    %37 = vector.load %arg1[%c3, %c0_31, %c0_32] : memref<15x36x128xf32, #tpu.memory_space<vmem>>, vector<1x36x128xf32>
    %38 = vector.shape_cast %37 : vector<1x36x128xf32> to vector<36x128xf32>
    %cst_33 = arith.constant dense<0.000000e+00> : vector<32x128xf32>
    %39 = tpu.matmul %0, %38, %cst_33 {dimension_numbers = #tpu.dot_dimension_numbers<[1], [0], [0], [1], [0, 0, 1, 1], [], []>} : vector<32x36xf32>, vector<36x128xf32>, vector<32x128xf32> -> vector<32x128xf32>
    %40 = arith.addf %39, %6 : vector<32x128xf32>
    %cst_34 = arith.constant 0.000000e+00 : f32
    %41 = vector.broadcast %cst_34 : f32 to vector<32x128xf32>
    %42 = arith.maximumf %40, %41 : vector<32x128xf32>
    %c96 = arith.constant 96 : index
    %c0_35 = arith.constant 0 : index
    %43 = vector.load %arg11[%c96, %c0_35] : memref<480x128xf32, #tpu.memory_space<vmem>>, vector<32x128xf32>
    tpu.vector_store %arg11[%c96, %c0_35], %42 {strides = array<i32>} : memref<480x128xf32, #tpu.memory_space<vmem>>, vector<32x128xf32>,
    %c4 = arith.constant 4 : index
    %c0_36 = arith.constant 0 : index
    %c0_37 = arith.constant 0 : index
    %44 = vector.load %arg1[%c4, %c0_36, %c0_37] : memref<15x36x128xf32, #tpu.memory_space<vmem>>, vector<1x36x128xf32>
    %45 = vector.shape_cast %44 : vector<1x36x128xf32> to vector<36x128xf32>
    %cst_38 = arith.constant dense<0.000000e+00> : vector<32x128xf32>
    %46 = tpu.matmul %0, %45, %cst_38 {dimension_numbers = #tpu.dot_dimension_numbers<[1], [0], [0], [1], [0, 0, 1, 1], [], []>} : vector<32x36xf32>, vector<36x128xf32>, vector<32x128xf32> -> vector<32x128xf32>
    %47 = arith.addf %46, %6 : vector<32x128xf32>
    %cst_39 = arith.constant 0.000000e+00 : f32
    %48 = vector.broadcast %cst_39 : f32 to vector<32x128xf32>
    %49 = arith.maximumf %47, %48 : vector<32x128xf32>
    %c128 = arith.constant 128 : index
    %c0_40 = arith.constant 0 : index
    %50 = vector.load %arg11[%c128, %c0_40] : memref<480x128xf32, #tpu.memory_space<vmem>>, vector<32x128xf32>
    tpu.vector_store %arg11[%c128, %c0_40], %49 {strides = array<i32>} : memref<480x128xf32, #tpu.memory_space<vmem>>, vector<32x128xf32>,
    %c5 = arith.constant 5 : index
    %c0_41 = arith.constant 0 : index
    %c0_42 = arith.constant 0 : index
    %51 = vector.load %arg1[%c5, %c0_41, %c0_42] : memref<15x36x128xf32, #tpu.memory_space<vmem>>, vector<1x36x128xf32>
    %52 = vector.shape_cast %51 : vector<1x36x128xf32> to vector<36x128xf32>
    %cst_43 = arith.constant dense<0.000000e+00> : vector<32x128xf32>
    %53 = tpu.matmul %0, %52, %cst_43 {dimension_numbers = #tpu.dot_dimension_numbers<[1], [0], [0], [1], [0, 0, 1, 1], [], []>} : vector<32x36xf32>, vector<36x128xf32>, vector<32x128xf32> -> vector<32x128xf32>
    %54 = arith.addf %53, %6 : vector<32x128xf32>
    %cst_44 = arith.constant 0.000000e+00 : f32
    %55 = vector.broadcast %cst_44 : f32 to vector<32x128xf32>
    %56 = arith.maximumf %54, %55 : vector<32x128xf32>
    %c160 = arith.constant 160 : index
    %c0_45 = arith.constant 0 : index
    %57 = vector.load %arg11[%c160, %c0_45] : memref<480x128xf32, #tpu.memory_space<vmem>>, vector<32x128xf32>
    tpu.vector_store %arg11[%c160, %c0_45], %56 {strides = array<i32>} : memref<480x128xf32, #tpu.memory_space<vmem>>, vector<32x128xf32>,
    %c6 = arith.constant 6 : index
    %c0_46 = arith.constant 0 : index
    %c0_47 = arith.constant 0 : index
    %58 = vector.load %arg1[%c6, %c0_46, %c0_47] : memref<15x36x128xf32, #tpu.memory_space<vmem>>, vector<1x36x128xf32>
    %59 = vector.shape_cast %58 : vector<1x36x128xf32> to vector<36x128xf32>
    %cst_48 = arith.constant dense<0.000000e+00> : vector<32x128xf32>
    %60 = tpu.matmul %0, %59, %cst_48 {dimension_numbers = #tpu.dot_dimension_numbers<[1], [0], [0], [1], [0, 0, 1, 1], [], []>} : vector<32x36xf32>, vector<36x128xf32>, vector<32x128xf32> -> vector<32x128xf32>
    %61 = arith.addf %60, %6 : vector<32x128xf32>
    %cst_49 = arith.constant 0.000000e+00 : f32
    %62 = vector.broadcast %cst_49 : f32 to vector<32x128xf32>
    %63 = arith.maximumf %61, %62 : vector<32x128xf32>
    %c192 = arith.constant 192 : index
    %c0_50 = arith.constant 0 : index
    %64 = vector.load %arg11[%c192, %c0_50] : memref<480x128xf32, #tpu.memory_space<vmem>>, vector<32x128xf32>
    tpu.vector_store %arg11[%c192, %c0_50], %63 {strides = array<i32>} : memref<480x128xf32, #tpu.memory_space<vmem>>, vector<32x128xf32>,
    %c7 = arith.constant 7 : index
    %c0_51 = arith.constant 0 : index
    %c0_52 = arith.constant 0 : index
    %65 = vector.load %arg1[%c7, %c0_51, %c0_52] : memref<15x36x128xf32, #tpu.memory_space<vmem>>, vector<1x36x128xf32>
    %66 = vector.shape_cast %65 : vector<1x36x128xf32> to vector<36x128xf32>
    %cst_53 = arith.constant dense<0.000000e+00> : vector<32x128xf32>
    %67 = tpu.matmul %0, %66, %cst_53 {dimension_numbers = #tpu.dot_dimension_numbers<[1], [0], [0], [1], [0, 0, 1, 1], [], []>} : vector<32x36xf32>, vector<36x128xf32>, vector<32x128xf32> -> vector<32x128xf32>
    %68 = arith.addf %67, %6 : vector<32x128xf32>
    %cst_54 = arith.constant 0.000000e+00 : f32
    %69 = vector.broadcast %cst_54 : f32 to vector<32x128xf32>
    %70 = arith.maximumf %68, %69 : vector<32x128xf32>
    %c224 = arith.constant 224 : index
    %c0_55 = arith.constant 0 : index
    %71 = vector.load %arg11[%c224, %c0_55] : memref<480x128xf32, #tpu.memory_space<vmem>>, vector<32x128xf32>
    tpu.vector_store %arg11[%c224, %c0_55], %70 {strides = array<i32>} : memref<480x128xf32, #tpu.memory_space<vmem>>, vector<32x128xf32>,
    %c8 = arith.constant 8 : index
    %c0_56 = arith.constant 0 : index
    %c0_57 = arith.constant 0 : index
    %72 = vector.load %arg1[%c8, %c0_56, %c0_57] : memref<15x36x128xf32, #tpu.memory_space<vmem>>, vector<1x36x128xf32>
    %73 = vector.shape_cast %72 : vector<1x36x128xf32> to vector<36x128xf32>
    %cst_58 = arith.constant dense<0.000000e+00> : vector<32x128xf32>
    %74 = tpu.matmul %0, %73, %cst_58 {dimension_numbers = #tpu.dot_dimension_numbers<[1], [0], [0], [1], [0, 0, 1, 1], [], []>} : vector<32x36xf32>, vector<36x128xf32>, vector<32x128xf32> -> vector<32x128xf32>
    %75 = arith.addf %74, %6 : vector<32x128xf32>
    %cst_59 = arith.constant 0.000000e+00 : f32
    %76 = vector.broadcast %cst_59 : f32 to vector<32x128xf32>
    %77 = arith.maximumf %75, %76 : vector<32x128xf32>
    %c256 = arith.constant 256 : index
    %c0_60 = arith.constant 0 : index
    %78 = vector.load %arg11[%c256, %c0_60] : memref<480x128xf32, #tpu.memory_space<vmem>>, vector<32x128xf32>
    tpu.vector_store %arg11[%c256, %c0_60], %77 {strides = array<i32>} : memref<480x128xf32, #tpu.memory_space<vmem>>, vector<32x128xf32>,
    %c9 = arith.constant 9 : index
    %c0_61 = arith.constant 0 : index
    %c0_62 = arith.constant 0 : index
    %79 = vector.load %arg1[%c9, %c0_61, %c0_62] : memref<15x36x128xf32, #tpu.memory_space<vmem>>, vector<1x36x128xf32>
    %80 = vector.shape_cast %79 : vector<1x36x128xf32> to vector<36x128xf32>
    %cst_63 = arith.constant dense<0.000000e+00> : vector<32x128xf32>
    %81 = tpu.matmul %0, %80, %cst_63 {dimension_numbers = #tpu.dot_dimension_numbers<[1], [0], [0], [1], [0, 0, 1, 1], [], []>} : vector<32x36xf32>, vector<36x128xf32>, vector<32x128xf32> -> vector<32x128xf32>
    %82 = arith.addf %81, %6 : vector<32x128xf32>
    %cst_64 = arith.constant 0.000000e+00 : f32
    %83 = vector.broadcast %cst_64 : f32 to vector<32x128xf32>
    %84 = arith.maximumf %82, %83 : vector<32x128xf32>
    %c288 = arith.constant 288 : index
    %c0_65 = arith.constant 0 : index
    %85 = vector.load %arg11[%c288, %c0_65] : memref<480x128xf32, #tpu.memory_space<vmem>>, vector<32x128xf32>
    tpu.vector_store %arg11[%c288, %c0_65], %84 {strides = array<i32>} : memref<480x128xf32, #tpu.memory_space<vmem>>, vector<32x128xf32>,
    %c10 = arith.constant 10 : index
    %c0_66 = arith.constant 0 : index
    %c0_67 = arith.constant 0 : index
    %86 = vector.load %arg1[%c10, %c0_66, %c0_67] : memref<15x36x128xf32, #tpu.memory_space<vmem>>, vector<1x36x128xf32>
    %87 = vector.shape_cast %86 : vector<1x36x128xf32> to vector<36x128xf32>
    %cst_68 = arith.constant dense<0.000000e+00> : vector<32x128xf32>
    %88 = tpu.matmul %0, %87, %cst_68 {dimension_numbers = #tpu.dot_dimension_numbers<[1], [0], [0], [1], [0, 0, 1, 1], [], []>} : vector<32x36xf32>, vector<36x128xf32>, vector<32x128xf32> -> vector<32x128xf32>
    %89 = arith.addf %88, %6 : vector<32x128xf32>
    %cst_69 = arith.constant 0.000000e+00 : f32
    %90 = vector.broadcast %cst_69 : f32 to vector<32x128xf32>
    %91 = arith.maximumf %89, %90 : vector<32x128xf32>
    %c320 = arith.constant 320 : index
    %c0_70 = arith.constant 0 : index
    %92 = vector.load %arg11[%c320, %c0_70] : memref<480x128xf32, #tpu.memory_space<vmem>>, vector<32x128xf32>
    tpu.vector_store %arg11[%c320, %c0_70], %91 {strides = array<i32>} : memref<480x128xf32, #tpu.memory_space<vmem>>, vector<32x128xf32>,
    %c11 = arith.constant 11 : index
    %c0_71 = arith.constant 0 : index
    %c0_72 = arith.constant 0 : index
    %93 = vector.load %arg1[%c11, %c0_71, %c0_72] : memref<15x36x128xf32, #tpu.memory_space<vmem>>, vector<1x36x128xf32>
    %94 = vector.shape_cast %93 : vector<1x36x128xf32> to vector<36x128xf32>
    %cst_73 = arith.constant dense<0.000000e+00> : vector<32x128xf32>
    %95 = tpu.matmul %0, %94, %cst_73 {dimension_numbers = #tpu.dot_dimension_numbers<[1], [0], [0], [1], [0, 0, 1, 1], [], []>} : vector<32x36xf32>, vector<36x128xf32>, vector<32x128xf32> -> vector<32x128xf32>
    %96 = arith.addf %95, %6 : vector<32x128xf32>
    %cst_74 = arith.constant 0.000000e+00 : f32
    %97 = vector.broadcast %cst_74 : f32 to vector<32x128xf32>
    %98 = arith.maximumf %96, %97 : vector<32x128xf32>
    %c352 = arith.constant 352 : index
    %c0_75 = arith.constant 0 : index
    %99 = vector.load %arg11[%c352, %c0_75] : memref<480x128xf32, #tpu.memory_space<vmem>>, vector<32x128xf32>
    tpu.vector_store %arg11[%c352, %c0_75], %98 {strides = array<i32>} : memref<480x128xf32, #tpu.memory_space<vmem>>, vector<32x128xf32>,
    %c12 = arith.constant 12 : index
    %c0_76 = arith.constant 0 : index
    %c0_77 = arith.constant 0 : index
    %100 = vector.load %arg1[%c12, %c0_76, %c0_77] : memref<15x36x128xf32, #tpu.memory_space<vmem>>, vector<1x36x128xf32>
    %101 = vector.shape_cast %100 : vector<1x36x128xf32> to vector<36x128xf32>
    %cst_78 = arith.constant dense<0.000000e+00> : vector<32x128xf32>
    %102 = tpu.matmul %0, %101, %cst_78 {dimension_numbers = #tpu.dot_dimension_numbers<[1], [0], [0], [1], [0, 0, 1, 1], [], []>} : vector<32x36xf32>, vector<36x128xf32>, vector<32x128xf32> -> vector<32x128xf32>
    %103 = arith.addf %102, %6 : vector<32x128xf32>
    %cst_79 = arith.constant 0.000000e+00 : f32
    %104 = vector.broadcast %cst_79 : f32 to vector<32x128xf32>
    %105 = arith.maximumf %103, %104 : vector<32x128xf32>
    %c384 = arith.constant 384 : index
    %c0_80 = arith.constant 0 : index
    %106 = vector.load %arg11[%c384, %c0_80] : memref<480x128xf32, #tpu.memory_space<vmem>>, vector<32x128xf32>
    tpu.vector_store %arg11[%c384, %c0_80], %105 {strides = array<i32>} : memref<480x128xf32, #tpu.memory_space<vmem>>, vector<32x128xf32>,
    %c13 = arith.constant 13 : index
    %c0_81 = arith.constant 0 : index
    %c0_82 = arith.constant 0 : index
    %107 = vector.load %arg1[%c13, %c0_81, %c0_82] : memref<15x36x128xf32, #tpu.memory_space<vmem>>, vector<1x36x128xf32>
    %108 = vector.shape_cast %107 : vector<1x36x128xf32> to vector<36x128xf32>
    %cst_83 = arith.constant dense<0.000000e+00> : vector<32x128xf32>
    %109 = tpu.matmul %0, %108, %cst_83 {dimension_numbers = #tpu.dot_dimension_numbers<[1], [0], [0], [1], [0, 0, 1, 1], [], []>} : vector<32x36xf32>, vector<36x128xf32>, vector<32x128xf32> -> vector<32x128xf32>
    %110 = arith.addf %109, %6 : vector<32x128xf32>
    %cst_84 = arith.constant 0.000000e+00 : f32
    %111 = vector.broadcast %cst_84 : f32 to vector<32x128xf32>
    %112 = arith.maximumf %110, %111 : vector<32x128xf32>
    %c416 = arith.constant 416 : index
    %c0_85 = arith.constant 0 : index
    %113 = vector.load %arg11[%c416, %c0_85] : memref<480x128xf32, #tpu.memory_space<vmem>>, vector<32x128xf32>
    tpu.vector_store %arg11[%c416, %c0_85], %112 {strides = array<i32>} : memref<480x128xf32, #tpu.memory_space<vmem>>, vector<32x128xf32>,
    %c14 = arith.constant 14 : index
    %c0_86 = arith.constant 0 : index
    %c0_87 = arith.constant 0 : index
    %114 = vector.load %arg1[%c14, %c0_86, %c0_87] : memref<15x36x128xf32, #tpu.memory_space<vmem>>, vector<1x36x128xf32>
    %115 = vector.shape_cast %114 : vector<1x36x128xf32> to vector<36x128xf32>
    %cst_88 = arith.constant dense<0.000000e+00> : vector<32x128xf32>
    %116 = tpu.matmul %0, %115, %cst_88 {dimension_numbers = #tpu.dot_dimension_numbers<[1], [0], [0], [1], [0, 0, 1, 1], [], []>} : vector<32x36xf32>, vector<36x128xf32>, vector<32x128xf32> -> vector<32x128xf32>
    %117 = arith.addf %116, %6 : vector<32x128xf32>
    %cst_89 = arith.constant 0.000000e+00 : f32
    %118 = vector.broadcast %cst_89 : f32 to vector<32x128xf32>
    %119 = arith.maximumf %117, %118 : vector<32x128xf32>
    %c448 = arith.constant 448 : index
    %c0_90 = arith.constant 0 : index
    %120 = vector.load %arg11[%c448, %c0_90] : memref<480x128xf32, #tpu.memory_space<vmem>>, vector<32x128xf32>
    tpu.vector_store %arg11[%c448, %c0_90], %119 {strides = array<i32>} : memref<480x128xf32, #tpu.memory_space<vmem>>, vector<32x128xf32>,
    %c0_91 = arith.constant 0 : index
    %c0_92 = arith.constant 0 : index
    %121 = vector.load %arg11[%c0_91, %c0_92] : memref<480x128xf32, #tpu.memory_space<vmem>>, vector<96x128xf32>
    %cst_93 = arith.constant dense<0.000000e+00> : vector<32x128xf32>
    %122 = tpu.matmul %1, %121, %cst_93 {dimension_numbers = #tpu.dot_dimension_numbers<[1], [0], [0], [1], [0, 0, 1, 1], [], []>} : vector<32x96xf32>, vector<96x128xf32>, vector<32x128xf32> -> vector<32x128xf32>
    %123 = arith.addf %122, %9 : vector<32x128xf32>
    %cst_94 = arith.constant 0.000000e+00 : f32
    %124 = vector.broadcast %cst_94 : f32 to vector<32x128xf32>
    %125 = arith.maximumf %123, %124 : vector<32x128xf32>
    %c0_95 = arith.constant 0 : index
    %c0_96 = arith.constant 0 : index
    %126 = vector.load %arg12[%c0_95, %c0_96] : memref<224x128xf32, #tpu.memory_space<vmem>>, vector<32x128xf32>
    tpu.vector_store %arg12[%c0_95, %c0_96], %125 {strides = array<i32>} : memref<224x128xf32, #tpu.memory_space<vmem>>, vector<32x128xf32>,
    %c64_97 = arith.constant 64 : index
    %c0_98 = arith.constant 0 : index
    %127 = vector.load %arg11[%c64_97, %c0_98] : memref<480x128xf32, #tpu.memory_space<vmem>>, vector<96x128xf32>
    %cst_99 = arith.constant dense<0.000000e+00> : vector<32x128xf32>
    %128 = tpu.matmul %1, %127, %cst_99 {dimension_numbers = #tpu.dot_dimension_numbers<[1], [0], [0], [1], [0, 0, 1, 1], [], []>} : vector<32x96xf32>, vector<96x128xf32>, vector<32x128xf32> -> vector<32x128xf32>
    %129 = arith.addf %128, %9 : vector<32x128xf32>
    %cst_100 = arith.constant 0.000000e+00 : f32
    %130 = vector.broadcast %cst_100 : f32 to vector<32x128xf32>
    %131 = arith.maximumf %129, %130 : vector<32x128xf32>
    %c32_101 = arith.constant 32 : index
    %c0_102 = arith.constant 0 : index
    %132 = vector.load %arg12[%c32_101, %c0_102] : memref<224x128xf32, #tpu.memory_space<vmem>>, vector<32x128xf32>
    tpu.vector_store %arg12[%c32_101, %c0_102], %131 {strides = array<i32>} : memref<224x128xf32, #tpu.memory_space<vmem>>, vector<32x128xf32>,
    %c128_103 = arith.constant 128 : index
    %c0_104 = arith.constant 0 : index
    %133 = vector.load %arg11[%c128_103, %c0_104] : memref<480x128xf32, #tpu.memory_space<vmem>>, vector<96x128xf32>
    %cst_105 = arith.constant dense<0.000000e+00> : vector<32x128xf32>
    %134 = tpu.matmul %1, %133, %cst_105 {dimension_numbers = #tpu.dot_dimension_numbers<[1], [0], [0], [1], [0, 0, 1, 1], [], []>} : vector<32x96xf32>, vector<96x128xf32>, vector<32x128xf32> -> vector<32x128xf32>
    %135 = arith.addf %134, %9 : vector<32x128xf32>
    %cst_106 = arith.constant 0.000000e+00 : f32
    %136 = vector.broadcast %cst_106 : f32 to vector<32x128xf32>
    %137 = arith.maximumf %135, %136 : vector<32x128xf32>
    %c64_107 = arith.constant 64 : index
    %c0_108 = arith.constant 0 : index
    %138 = vector.load %arg12[%c64_107, %c0_108] : memref<224x128xf32, #tpu.memory_space<vmem>>, vector<32x128xf32>
    tpu.vector_store %arg12[%c64_107, %c0_108], %137 {strides = array<i32>} : memref<224x128xf32, #tpu.memory_space<vmem>>, vector<32x128xf32>,
    %c192_109 = arith.constant 192 : index
    %c0_110 = arith.constant 0 : index
    %139 = vector.load %arg11[%c192_109, %c0_110] : memref<480x128xf32, #tpu.memory_space<vmem>>, vector<96x128xf32>
    %cst_111 = arith.constant dense<0.000000e+00> : vector<32x128xf32>
    %140 = tpu.matmul %1, %139, %cst_111 {dimension_numbers = #tpu.dot_dimension_numbers<[1], [0], [0], [1], [0, 0, 1, 1], [], []>} : vector<32x96xf32>, vector<96x128xf32>, vector<32x128xf32> -> vector<32x128xf32>
    %141 = arith.addf %140, %9 : vector<32x128xf32>
    %cst_112 = arith.constant 0.000000e+00 : f32
    %142 = vector.broadcast %cst_112 : f32 to vector<32x128xf32>
    %143 = arith.maximumf %141, %142 : vector<32x128xf32>
    %c96_113 = arith.constant 96 : index
    %c0_114 = arith.constant 0 : index
    %144 = vector.load %arg12[%c96_113, %c0_114] : memref<224x128xf32, #tpu.memory_space<vmem>>, vector<32x128xf32>
    tpu.vector_store %arg12[%c96_113, %c0_114], %143 {strides = array<i32>} : memref<224x128xf32, #tpu.memory_space<vmem>>, vector<32x128xf32>,
    %c256_115 = arith.constant 256 : index
    %c0_116 = arith.constant 0 : index
    %145 = vector.load %arg11[%c256_115, %c0_116] : memref<480x128xf32, #tpu.memory_space<vmem>>, vector<96x128xf32>
    %cst_117 = arith.constant dense<0.000000e+00> : vector<32x128xf32>
    %146 = tpu.matmul %1, %145, %cst_117 {dimension_numbers = #tpu.dot_dimension_numbers<[1], [0], [0], [1], [0, 0, 1, 1], [], []>} : vector<32x96xf32>, vector<96x128xf32>, vector<32x128xf32> -> vector<32x128xf32>
    %147 = arith.addf %146, %9 : vector<32x128xf32>
    %cst_118 = arith.constant 0.000000e+00 : f32
    %148 = vector.broadcast %cst_118 : f32 to vector<32x128xf32>
    %149 = arith.maximumf %147, %148 : vector<32x128xf32>
    %c128_119 = arith.constant 128 : index
    %c0_120 = arith.constant 0 : index
    %150 = vector.load %arg12[%c128_119, %c0_120] : memref<224x128xf32, #tpu.memory_space<vmem>>, vector<32x128xf32>
    tpu.vector_store %arg12[%c128_119, %c0_120], %149 {strides = array<i32>} : memref<224x128xf32, #tpu.memory_space<vmem>>, vector<32x128xf32>,
    %c320_121 = arith.constant 320 : index
    %c0_122 = arith.constant 0 : index
    %151 = vector.load %arg11[%c320_121, %c0_122] : memref<480x128xf32, #tpu.memory_space<vmem>>, vector<96x128xf32>
    %cst_123 = arith.constant dense<0.000000e+00> : vector<32x128xf32>
    %152 = tpu.matmul %1, %151, %cst_123 {dimension_numbers = #tpu.dot_dimension_numbers<[1], [0], [0], [1], [0, 0, 1, 1], [], []>} : vector<32x96xf32>, vector<96x128xf32>, vector<32x128xf32> -> vector<32x128xf32>
    %153 = arith.addf %152, %9 : vector<32x128xf32>
    %cst_124 = arith.constant 0.000000e+00 : f32
    %154 = vector.broadcast %cst_124 : f32 to vector<32x128xf32>
    %155 = arith.maximumf %153, %154 : vector<32x128xf32>
    %c160_125 = arith.constant 160 : index
    %c0_126 = arith.constant 0 : index
    %156 = vector.load %arg12[%c160_125, %c0_126] : memref<224x128xf32, #tpu.memory_space<vmem>>, vector<32x128xf32>
    tpu.vector_store %arg12[%c160_125, %c0_126], %155 {strides = array<i32>} : memref<224x128xf32, #tpu.memory_space<vmem>>, vector<32x128xf32>,
    %c384_127 = arith.constant 384 : index
    %c0_128 = arith.constant 0 : index
    %157 = vector.load %arg11[%c384_127, %c0_128] : memref<480x128xf32, #tpu.memory_space<vmem>>, vector<96x128xf32>
    %cst_129 = arith.constant dense<0.000000e+00> : vector<32x128xf32>
    %158 = tpu.matmul %1, %157, %cst_129 {dimension_numbers = #tpu.dot_dimension_numbers<[1], [0], [0], [1], [0, 0, 1, 1], [], []>} : vector<32x96xf32>, vector<96x128xf32>, vector<32x128xf32> -> vector<32x128xf32>
    %159 = arith.addf %158, %9 : vector<32x128xf32>
    %cst_130 = arith.constant 0.000000e+00 : f32
    %160 = vector.broadcast %cst_130 : f32 to vector<32x128xf32>
    %161 = arith.maximumf %159, %160 : vector<32x128xf32>
    %c192_131 = arith.constant 192 : index
    %c0_132 = arith.constant 0 : index
    %162 = vector.load %arg12[%c192_131, %c0_132] : memref<224x128xf32, #tpu.memory_space<vmem>>, vector<32x128xf32>
    tpu.vector_store %arg12[%c192_131, %c0_132], %161 {strides = array<i32>} : memref<224x128xf32, #tpu.memory_space<vmem>>, vector<32x128xf32>,
    %c0_133 = arith.constant 0 : index
    %c0_134 = arith.constant 0 : index
    %163 = vector.load %arg12[%c0_133, %c0_134] : memref<224x128xf32, #tpu.memory_space<vmem>>, vector<96x128xf32>
    %cst_135 = arith.constant dense<0.000000e+00> : vector<32x128xf32>
    %164 = tpu.matmul %2, %163, %cst_135 {dimension_numbers = #tpu.dot_dimension_numbers<[1], [0], [0], [1], [0, 0, 1, 1], [], []>} : vector<32x96xf32>, vector<96x128xf32>, vector<32x128xf32> -> vector<32x128xf32>
    %165 = arith.addf %164, %12 : vector<32x128xf32>
    %cst_136 = arith.constant 0.000000e+00 : f32
    %166 = vector.broadcast %cst_136 : f32 to vector<32x128xf32>
    %167 = arith.maximumf %165, %166 : vector<32x128xf32>
    %c0_137 = arith.constant 0 : index
    %c0_138 = arith.constant 0 : index
    %168 = vector.load %arg13[%c0_137, %c0_138] : memref<96x128xf32, #tpu.memory_space<vmem>>, vector<32x128xf32>
    tpu.vector_store %arg13[%c0_137, %c0_138], %167 {strides = array<i32>} : memref<96x128xf32, #tpu.memory_space<vmem>>, vector<32x128xf32>,
    %c64_139 = arith.constant 64 : index
    %c0_140 = arith.constant 0 : index
    %169 = vector.load %arg12[%c64_139, %c0_140] : memref<224x128xf32, #tpu.memory_space<vmem>>, vector<96x128xf32>
    %cst_141 = arith.constant dense<0.000000e+00> : vector<32x128xf32>
    %170 = tpu.matmul %2, %169, %cst_141 {dimension_numbers = #tpu.dot_dimension_numbers<[1], [0], [0], [1], [0, 0, 1, 1], [], []>} : vector<32x96xf32>, vector<96x128xf32>, vector<32x128xf32> -> vector<32x128xf32>
    %171 = arith.addf %170, %12 : vector<32x128xf32>
    %cst_142 = arith.constant 0.000000e+00 : f32
    %172 = vector.broadcast %cst_142 : f32 to vector<32x128xf32>
    %173 = arith.maximumf %171, %172 : vector<32x128xf32>
    %c32_143 = arith.constant 32 : index
    %c0_144 = arith.constant 0 : index
    %174 = vector.load %arg13[%c32_143, %c0_144] : memref<96x128xf32, #tpu.memory_space<vmem>>, vector<32x128xf32>
    tpu.vector_store %arg13[%c32_143, %c0_144], %173 {strides = array<i32>} : memref<96x128xf32, #tpu.memory_space<vmem>>, vector<32x128xf32>,
    %c128_145 = arith.constant 128 : index
    %c0_146 = arith.constant 0 : index
    %175 = vector.load %arg12[%c128_145, %c0_146] : memref<224x128xf32, #tpu.memory_space<vmem>>, vector<96x128xf32>
    %cst_147 = arith.constant dense<0.000000e+00> : vector<32x128xf32>
    %176 = tpu.matmul %2, %175, %cst_147 {dimension_numbers = #tpu.dot_dimension_numbers<[1], [0], [0], [1], [0, 0, 1, 1], [], []>} : vector<32x96xf32>, vector<96x128xf32>, vector<32x128xf32> -> vector<32x128xf32>
    %177 = arith.addf %176, %12 : vector<32x128xf32>
    %cst_148 = arith.constant 0.000000e+00 : f32
    %178 = vector.broadcast %cst_148 : f32 to vector<32x128xf32>
    %179 = arith.maximumf %177, %178 : vector<32x128xf32>
    %c64_149 = arith.constant 64 : index
    %c0_150 = arith.constant 0 : index
    %180 = vector.load %arg13[%c64_149, %c0_150] : memref<96x128xf32, #tpu.memory_space<vmem>>, vector<32x128xf32>
    tpu.vector_store %arg13[%c64_149, %c0_150], %179 {strides = array<i32>} : memref<96x128xf32, #tpu.memory_space<vmem>>, vector<32x128xf32>,
    %c0_151 = arith.constant 0 : index
    %c0_152 = arith.constant 0 : index
    %181 = vector.load %arg13[%c0_151, %c0_152] : memref<96x128xf32, #tpu.memory_space<vmem>>, vector<96x128xf32>
    %cst_153 = arith.constant dense<0.000000e+00> : vector<6x128xf32>
    %182 = tpu.matmul %3, %181, %cst_153 {dimension_numbers = #tpu.dot_dimension_numbers<[1], [0], [0], [1], [0, 0, 1, 1], [], []>} : vector<6x96xf32>, vector<96x128xf32>, vector<6x128xf32> -> vector<6x128xf32>
    %183 = arith.addf %182, %15 : vector<6x128xf32>
    %c0_154 = arith.constant 0 : index
    %c0_155 = arith.constant 0 : index
    %184 = vector.load %arg10[%c0_154, %c0_155] : memref<6x128xf32, #tpu.memory_space<vmem>>, vector<6x128xf32>
    tpu.vector_store %arg10[%c0_154, %c0_155], %183 {strides = array<i32>} : memref<6x128xf32, #tpu.memory_space<vmem>>, vector<6x128xf32>,
    return
  }
  func.func @transform_0(%arg0: i32) -> (i32, i32, i32) {
    %c0_i32 = arith.constant 0 : i32
    %c0_i32_0 = arith.constant 0 : i32
    %c0_i32_1 = arith.constant 0 : i32
    return %c0_i32, %c0_i32_0, %arg0 : i32, i32, i32
  }
  func.func @transform_1(%arg0: i32) -> (i32, i32) {
    %c0_i32 = arith.constant 0 : i32
    %c0_i32_0 = arith.constant 0 : i32
    %c0_i32_1 = arith.constant 0 : i32
    return %c0_i32, %c0_i32_0 : i32, i32
  }
  func.func @transform_2(%arg0: i32) -> (i32, i32) {
    %c0_i32 = arith.constant 0 : i32
    %c0_i32_0 = arith.constant 0 : i32
    %c0_i32_1 = arith.constant 0 : i32
    return %c0_i32, %c0_i32_0 : i32, i32
  }
  func.func @transform_3(%arg0: i32) -> (i32, i32) {
    %c0_i32 = arith.constant 0 : i32
    %c0_i32_0 = arith.constant 0 : i32
    %c0_i32_1 = arith.constant 0 : i32
    return %c0_i32, %c0_i32_0 : i32, i32
  }
  func.func @transform_4(%arg0: i32) -> (i32, i32) {
    %c0_i32 = arith.constant 0 : i32
    %c0_i32_0 = arith.constant 0 : i32
    %c0_i32_1 = arith.constant 0 : i32
    return %c0_i32, %c0_i32_0 : i32, i32
  }
  func.func @transform_5(%arg0: i32) -> (i32, i32) {
    %c0_i32 = arith.constant 0 : i32
    %c0_i32_0 = arith.constant 0 : i32
    %c0_i32_1 = arith.constant 0 : i32
    return %c0_i32, %c0_i32_0 : i32, i32
  }
  func.func @transform_6(%arg0: i32) -> (i32, i32) {
    %c0_i32 = arith.constant 0 : i32
    %c0_i32_0 = arith.constant 0 : i32
    %c0_i32_1 = arith.constant 0 : i32
    return %c0_i32, %c0_i32_0 : i32, i32
  }
  func.func @transform_7(%arg0: i32) -> (i32, i32) {
    %c0_i32 = arith.constant 0 : i32
    %c0_i32_0 = arith.constant 0 : i32
    %c0_i32_1 = arith.constant 0 : i32
    return %c0_i32, %c0_i32_0 : i32, i32
  }
  func.func @transform_8(%arg0: i32) -> (i32, i32) {
    %c0_i32 = arith.constant 0 : i32
    %c0_i32_0 = arith.constant 0 : i32
    %c0_i32_1 = arith.constant 0 : i32
    return %c0_i32, %c0_i32_0 : i32, i32
  }
  func.func @transform_9(%arg0: i32) -> (i32, i32) {
    %c0_i32 = arith.constant 0 : i32
    %c0_i32_0 = arith.constant 0 : i32
    return %c0_i32, %arg0 : i32, i32
  }
}

</mosaic_0001>

<bundles_post_ra>
// kernel: activity_cnn_forward.1
= control target key start
LH: loop header
LB: loop body
LE: loop exit
PB: predicated region body
PF: predicated region fallthrough
CT: control target
= control target key end

     0   :  { %vm141_vm0 = vcmask 1043456   ;;  %v1576_v3 = vmov 0   ;;  %vm128_vm1 = vcmask 293888   ;;  %vm838_vm2 = vcmask 785408   ;;  %s2454_s0 = inlined_call_operand.vmem [shape: f32[15,36,128], index: 0, kind: input, shape index: {}]   ;;  %s2455_s1 = inlined_call_operand.vmem [shape: f32[32,36], index: 1, kind: input, shape index: {}]   ;;  %s2456_s2 = inlined_call_operand.vmem [shape: f32[32,1], index: 2, kind: input, shape index: {}]   ;;  %s2457_s4 = inlined_call_operand.vmem [shape: f32[32,1], index: 4, kind: input, shape index: {}]   ;;  %s2458_s6 = inlined_call_operand.vmem [shape: f32[32,1], index: 6, kind: input, shape index: {}]   ;;  %s2459_s8 = inlined_call_operand.vmem [shape: f32[6,1], index: 8, kind: input, shape index: {}]   ;;  %s2460_s3 = inlined_call_operand.vmem [shape: f32[32,96], index: 3, kind: input, shape index: {}]   ;;  %s2461_s5 = inlined_call_operand.vmem [shape: f32[32,96], index: 5, kind: input, shape index: {}]   ;;  %s2462_s7 = inlined_call_operand.vmem [shape: f32[6,96], index: 7, kind: input, shape index: {}]   ;;  %s2463_s9 = inlined_call_operand.vmem [shape: f32[6,128], index: 9, kind: output, shape index: {}]  }
   0x1   :  { %v127_v0 = vld [vmem:[%s2454_s0 + $0x20] sm:$0xf]  ;;  %v1390_v1 = vld [vmem:[%s2454_s0 + $0x48] sm:$0xf]  ;;  %v126_v2 = vld [vmem:[%s2454_s0 + $0x18] sm:$0xff]  ;;  %1573 = vset.pattern.permute.xlu0 %v1576_v3  ;;  %1574 = vset.pattern.permute.xlu1 %v1576_v3 }
   0x2   :  { %1381 = vmatpush.msk.msra.mxu0 %vm141_vm0, %v127_v0  ;;  %1567 = vmatpush.msk.msra.mxu2 %vm141_vm0, %v127_v0  ;;  %v1389_v4 = vld [vmem:[%s2454_s0 + $0x40] sm:$0xff]  ;;  %v125_v5 = vld [vmem:[%s2454_s0 + $0x10] sm:$0xff]  ;;  %v1410_v6 = vld [vmem:[%s2454_s0 + $0x98] sm:$0xf] }
   0x3   :  { %1391 = vmatpush.msk.msra.mxu1 %vm141_vm0, %v1390_v1  ;;  %1575 = vset.pattern.permute.xlu2 %v1576_v3  ;;  %v1388_v7 = vld [vmem:[%s2454_s0 + $0x38] sm:$0xff]  ;;  %v1409_v8 = vld [vmem:[%s2454_s0 + $0x90] sm:$0xff]  ;;  %v124_v9 = vld [vmem:[%s2454_s0 + $0x8] sm:$0xff] }
   0x4   :  { %157 = vmatpush.msra.mxu0 %v126_v2  ;;  %1568 = vmatpush.msra.mxu2 %v126_v2  ;;  %v1387_v10 = vld [vmem:[%s2454_s0 + $0x30] sm:$0xff]  ;;  %v1408_v11 = vld [vmem:[%s2454_s0 + $0x88] sm:$0xff]  ;;  %v123_v12 = vld [vmem:[%s2454_s0] sm:$0xff] }
   0x5   :  { %203 = vmatpush.msra.mxu1 %v1389_v4  ;;  %1411 = vmatpush.msk.msra.mxu3 %vm141_vm0, %v1410_v6  ;;  %v1386_v13 = vld [vmem:[%s2454_s0 + $0x28] sm:$0xff]  ;;  %v1673_v14 = vld [vmem:[%s2455_s1] sm:$0xff]  ;;  %v1678_v15 = vld [vmem:[%s2455_s1 + $0x10] sm:$0xff] }
   0x6   :  { %158 = vmatpush.msra.mxu0 %v125_v5  ;;  %1569 = vmatpush.msra.mxu2 %v125_v5  ;;  %v1407_v16 = vld [vmem:[%s2454_s0 + $0x80] sm:$0xff]  ;;  %v1400_v17 = vld [vmem:[%s2454_s0 + $0x70] sm:$0xf]  ;;  %v48_v19 = vld [vmem:[%s2456_s2 + $0x18] sm:$0xff] }
   0x7   :  { %204 = vmatpush.msra.mxu1 %v1388_v7  ;;  %295 = vmatpush.msra.mxu3 %v1409_v8  ;;  %v1420_v18 = vld [vmem:[%s2454_s0 + $0xc0] sm:$0xf]  ;;  %v1406_v20 = vld [vmem:[%s2454_s0 + $0x78] sm:$0xff]  ;;  %v1399_v21 = vld [vmem:[%s2454_s0 + $0x68] sm:$0xff] }
   0x8   :  { %159 = vmatpush.msra.mxu0 %v124_v9  ;;  %1570 = vmatpush.msra.mxu2 %v124_v9  ;;  %v1419_v22 = vld [vmem:[%s2454_s0 + $0xb8] sm:$0xff]  ;;  %v1398_v23 = vld [vmem:[%s2454_s0 + $0x60] sm:$0xff]  ;;  %v1430_v24 = vld [vmem:[%s2454_s0 + $0xe8] sm:$0xf] }
   0x9   :  { %205 = vmatpush.msra.mxu1 %v1387_v10  ;;  %296 = vmatpush.msra.mxu3 %v1408_v11  ;;  %v1418_v25 = vld [vmem:[%s2454_s0 + $0xb0] sm:$0xff]  ;;  %v46_v26 = vld [vmem:[%s2456_s2 + $0x8] sm:$0xff]  ;;  %v1397_v28 = vld [vmem:[%s2454_s0 + $0x58] sm:$0xff] }
   0xa   :  { %160 = vmatpush.msra.mxu0 %v123_v12  ;;  %1571 = vmatpush.msra.mxu2 %v123_v12  ;;  %v1726_v27 = vld [vmem:[%s2455_s1 + $0x8] sm:$0xff]  ;;  %v1734_v29 = vld [vmem:[%s2455_s1 + $0x18] sm:$0xff]  ;;  %v1396_v31 = vld [vmem:[%s2454_s0 + $0x50] sm:$0xff] }
   0xb   :  { %206 = vmatpush.msra.mxu1 %v1386_v13  ;;  %1382 = vmatmul.msk.f32.vlgmr.msra.gmra.mxu0 %vm128_vm1, %v1673_v14  ;;  %v1417_v30 = vld [vmem:[%s2454_s0 + $0xa8] sm:$0xff]  ;;  %v47_v32 = vld [vmem:[%s2456_s2 + $0x10] sm:$0xff]  ;;  %v1429_v33 = vld [vmem:[%s2454_s0 + $0xe0] sm:$0xff] }
   0xc   :  { %1384 = vmatmul.msk.f32.vlgmr.msra.gmra.mxu2 %vm128_vm1, %v1678_v15  ;;  %1392 = vmatmul.msk.f32.vlgmr.msra.gmra.mxu1 %vm128_vm1, %v1673_v14  ;;  %v1416_v34 = vld [vmem:[%s2454_s0 + $0xa0] sm:$0xff]  ;;  %v1440_v35 = vld [vmem:[%s2454_s0 + $0x110] sm:$0xf]  ;;  %v1428_v36 = vld [vmem:[%s2454_s0 + $0xd8] sm:$0xff] }
   0xd   :  { %297 = vmatpush.msra.mxu3 %v1407_v16  ;;  %1401 = vmatpush.msk.msrb.mxu2 %vm141_vm0, %v1400_v17  ;;  %v1450_v37 = vld [vmem:[%s2454_s0 + $0x138] sm:$0xf]  ;;  %v1439_v38 = vld [vmem:[%s2454_s0 + $0x108] sm:$0xff]  ;;  %v1427_v39 = vld [vmem:[%s2454_s0 + $0xd0] sm:$0xff] }
   0xe   :  { %1421 = vmatpush.msk.msrb.mxu0 %vm141_vm0, %v1420_v18  ;;  %66 = vperm.xlu0 %1573, %v48_v19   ;;  %v45_v40 = vld [vmem:[%s2456_s2] sm:$0xff]  ;;  %v1449_v41 = vld [vmem:[%s2454_s0 + $0x130] sm:$0xff]  ;;  %v1426_v42 = vld [vmem:[%s2454_s0 + $0xc8] sm:$0xff] }
   0xf   :  { %298 = vmatpush.msra.mxu3 %v1406_v20  ;;  %249 = vmatpush.msrb.mxu2 %v1399_v21  ;;  %v1448_v43 = vld [vmem:[%s2454_s0 + $0x128] sm:$0xff]  ;;  %v1438_v44 = vld [vmem:[%s2454_s0 + $0x100] sm:$0xff]  ;;  %v1459_v47 = vld [vmem:[%s2454_s0 + $0x158] sm:$0xff] }
  0x10   :  { %1412 = vmatmul.msk.f32.vlgmr.msra.gmra.mxu3 %vm128_vm1, %v1673_v14  ;;  %341 = vmatpush.msrb.mxu0 %v1419_v22  ;;  %v1460_v45 = vld [vmem:[%s2454_s0 + $0x160] sm:$0xf]  ;;  %v1446_v48 = vld [vmem:[%s2454_s0 + $0x118] sm:$0xff]  ;;  %v1458_v50 = vld [vmem:[%s2454_s0 + $0x150] sm:$0xff] }
  0x11   :  { %250 = vmatpush.msrb.mxu2 %v1398_v23  ;;  %1431 = vmatpush.msk.msrb.mxu1 %vm141_vm0, %v1430_v24  ;;  %v1447_v46 = vld [vmem:[%s2454_s0 + $0x120] sm:$0xff]  ;;  %v1437_v49 = vld [vmem:[%s2454_s0 + $0xf8] sm:$0xff]  ;;  %v1436_v51 = vld [vmem:[%s2454_s0 + $0xf0] sm:$0xff] }
  0x12   :  { %342 = vmatpush.msrb.mxu0 %v1418_v25  ;;  %56 = vperm.xlu1 %1574, %v46_v26   ;;  %v1470_v52 = vld [vmem:[%s2454_s0 + $0x188] sm:$0xf]  ;;  %v1456_v54 = vld [vmem:[%s2454_s0 + $0x140] sm:$0xff]  ;;  %v1480_v56 = vld [vmem:[%s2454_s0 + $0x1b0] sm:$0xf] }
  0x13   :  { %1383 = vmatmul.msk.f32.gmra.mxu0 %vm128_vm1, %v1726_v27  ;;  %251 = vmatpush.msrb.mxu2 %v1397_v28  ;;  %v1457_v53 = vld [vmem:[%s2454_s0 + $0x148] sm:$0xff]  ;;  %v1469_v55 = vld [vmem:[%s2454_s0 + $0x180] sm:$0xff]  ;;  %v1468_v57 = vld [vmem:[%s2454_s0 + $0x178] sm:$0xff] }
  0x14   :  { %1385 = vmatmul.msk.f32.gmra.mxu2 %vm128_vm1, %v1734_v29  ;;  %1393 = vmatmul.msk.f32.gmra.mxu1 %vm128_vm1, %v1726_v27  ;;  %v1490_v58 = vld [vmem:[%s2454_s0 + $0x1d8] sm:$0xf]  ;;  %v1467_v59 = vld [vmem:[%s2454_s0 + $0x170] sm:$0xff]  ;;  %v1466_v60 = vld [vmem:[%s2454_s0 + $0x168] sm:$0xff] }
  0x15   :  { %343 = vmatpush.msrb.mxu0 %v1417_v30  ;;  %252 = vmatpush.msrb.mxu2 %v1396_v31  ;;  %v1489_v61 = vld [vmem:[%s2454_s0 + $0x1d0] sm:$0xff]  ;;  %v1479_v62 = vld [vmem:[%s2454_s0 + $0x1a8] sm:$0xff]  ;;  %v1487_v0 = vld [vmem:[%s2454_s0 + $0x1c0] sm:$0xff] }
  0x16   :  { %61 = vperm.xlu0 %1573, %v47_v32   ;;  %387 = vmatpush.msrb.mxu1 %v1429_v33  ;;  %v1488_v63 = vld [vmem:[%s2454_s0 + $0x1c8] sm:$0xff]  ;;  %v1478_v1 = vld [vmem:[%s2454_s0 + $0x1a0] sm:$0xff]  ;;  %v1486_v2 = vld [vmem:[%s2454_s0 + $0x1b8] sm:$0xff] }
  0x17   :  { %344 = vmatpush.msrb.mxu0 %v1416_v34  ;;  %1441 = vmatpush.msk.msra.mxu2 %vm141_vm0, %v1440_v35  ;;  %v1500_v3 = vld [vmem:[%s2454_s0 + $0x200] sm:$0xf]  ;;  %v1499_v4 = vld [vmem:[%s2454_s0 + $0x1f8] sm:$0xff]  ;;  %v1498_v5 = vld [vmem:[%s2454_s0 + $0x1f0] sm:$0xff] }
  0x18   :  { %1413 = vmatmul.msk.f32.gmra.mxu3 %vm128_vm1, %v1726_v27  ;;  %388 = vmatpush.msrb.mxu1 %v1428_v36  ;;  %v1477_v6 = vld [vmem:[%s2454_s0 + $0x198] sm:$0xff]  ;;  %v1497_v7 = vld [vmem:[%s2454_s0 + $0x1e8] sm:$0xff]  ;;  %v1476_v8 = vld [vmem:[%s2454_s0 + $0x190] sm:$0xff] }
  0x19   :  { %1451 = vmatpush.msk.msrb.mxu3 %vm141_vm0, %v1450_v37  ;;  %433 = vmatpush.msra.mxu2 %v1439_v38  ;;  %v1496_v9 = vld [vmem:[%s2454_s0 + $0x1e0] sm:$0xff]  ;;  %v1510_v10 = vld [vmem:[%s2454_s0 + $0x228] sm:$0xf]  ;;  %v1520_v12 = vld [vmem:[%s2454_s0 + $0x250] sm:$0xf] }
  0x1a   :  { %389 = vmatpush.msrb.mxu1 %v1427_v39  ;;  %51 = vperm.xlu1 %1574, %v45_v40   ;;  %v1509_v11 = vld [vmem:[%s2454_s0 + $0x220] sm:$0xff]  ;;  %v1508_v13 = vld [vmem:[%s2454_s0 + $0x218] sm:$0xff]  ;;  %v1507_v16 = vld [vmem:[%s2454_s0 + $0x210] sm:$0xff] }
  0x1b   :  { %1422 = vmatmul.msk.f32.vlgmr.msrb.gmra.mxu0 %vm128_vm1, %v1673_v14  ;;  %479 = vmatpush.msrb.mxu3 %v1449_v41  ;;  %v70_v17 = vld [vmem:[%s2457_s4 + $0x8] sm:$0xff]  ;;  %v1518_v20 = vld [vmem:[%s2454_s0 + $0x240] sm:$0xff]  ;;  %v95_v21 = vld [vmem:[%s2458_s6 + $0x10] sm:$0xff] }
  0x1c   :  { %1394 = vmatmul.msk.f32.gmra.mxu1 %vm128_vm1, %v1678_v15  ;;  %1402 = vmatmul.msk.f32.vlgmr.msrb.gmra.mxu2 %vm128_vm1, %v1673_v14  ;;  %v1506_v18 = vld [vmem:[%s2454_s0 + $0x208] sm:$0xff]  ;;  %v69_v22 = vld [vmem:[%s2457_s4] sm:$0xff]  ;;  %v1517_v23 = vld [vmem:[%s2454_s0 + $0x238] sm:$0xff] }
  0x1d   :  { %390 = vmatpush.msrb.mxu1 %v1426_v42  ;;  %480 = vmatpush.msrb.mxu3 %v1448_v43  ;;  %v1519_v19 = vld [vmem:[%s2454_s0 + $0x248] sm:$0xff]  ;;  %v1516_v24 = vld [vmem:[%s2454_s0 + $0x230] sm:$0xff]  ;;  %v117_v25 = vld [vmem:[%s2459_s8] sm:$0x3f] }
  0x1e   :  { %434 = vmatpush.msra.mxu2 %v1438_v44  ;;  %1461 = vmatpush.msk.msra.mxu0 %vm141_vm0, %v1460_v45  ;;  %v94_v26 = vld [vmem:[%s2458_s6 + $0x8] sm:$0xff] }
  0x1f   :  { %481 = vmatpush.msrb.mxu3 %v1447_v46  ;;  %1471 = vmatpush.msk.msra.mxu1 %vm141_vm0, %v1470_v52 }
  0x20   :  { %1414 = vmatmul.msk.f32.gmra.mxu3 %vm128_vm1, %v1678_v15  ;;  %525 = vmatpush.msra.mxu0 %v1459_v47 }
  0x21   :  { %482 = vmatpush.msrb.mxu3 %v1446_v48  ;;  %435 = vmatpush.msra.mxu2 %v1437_v49 }
  0x22   :  { %526 = vmatpush.msra.mxu0 %v1458_v50  ;;  %571 = vmatpush.msra.mxu1 %v1469_v55 }
  0x23   :  { %1423 = vmatmul.msk.f32.gmra.mxu0 %vm128_vm1, %v1726_v27  ;;  %436 = vmatpush.msra.mxu2 %v1436_v51 }
  0x24   :  { %1395 = vmatmul.msk.f32.gmra.mxu1 %vm128_vm1, %v1734_v29  ;;  %1403 = vmatmul.msk.f32.gmra.mxu2 %vm128_vm1, %v1726_v27 }
  0x25   :  { %527 = vmatpush.msra.mxu0 %v1457_v53  ;;  %1481 = vmatpush.msk.msrb.mxu2 %vm141_vm0, %v1480_v56 }
  0x26   :  { %1491 = vmatpush.msk.msra.mxu3 %vm141_vm0, %v1490_v58  ;;  %572 = vmatpush.msra.mxu1 %v1468_v57 }
  0x27   :  { %528 = vmatpush.msra.mxu0 %v1456_v54  ;;  %617 = vmatpush.msrb.mxu2 %v1479_v62 }
  0x28   :  { %1415 = vmatmul.msk.f32.gmra.mxu3 %vm128_vm1, %v1734_v29  ;;  %573 = vmatpush.msra.mxu1 %v1467_v59 }
  0x29   :  { %663 = vmatpush.msra.mxu3 %v1489_v61  ;;  %618 = vmatpush.msrb.mxu2 %v1478_v1 }
  0x2a   :  { %574 = vmatpush.msra.mxu1 %v1466_v60  ;;  %1501 = vmatpush.msk.msrb.mxu0 %vm141_vm0, %v1500_v3 }
  0x2b   :  { %1424 = vmatmul.msk.f32.gmra.mxu0 %vm128_vm1, %v1678_v15  ;;  %664 = vmatpush.msra.mxu3 %v1488_v63 }
  0x2c   :  { %1404 = vmatmul.msk.f32.gmra.mxu2 %vm128_vm1, %v1678_v15  ;;  %1432 = vmatmul.msk.f32.vlgmr.msrb.gmra.mxu1 %vm128_vm1, %v1673_v14 }
  0x2d   :  { %665 = vmatpush.msra.mxu3 %v1487_v0  ;;  %709 = vmatpush.msrb.mxu0 %v1499_v4 }
  0x2e   :  { %619 = vmatpush.msrb.mxu2 %v1477_v6  ;;  %1511 = vmatpush.msk.msrb.mxu1 %vm141_vm0, %v1510_v10 }
  0x2f   :  { %666 = vmatpush.msra.mxu3 %v1486_v2  ;;  %710 = vmatpush.msrb.mxu0 %v1498_v5 }
  0x30   :  { %1452 = vmatmul.msk.f32.vlgmr.msrb.gmra.mxu3 %vm128_vm1, %v1673_v14  ;;  %620 = vmatpush.msrb.mxu2 %v1476_v8 }
  0x31   :  { %711 = vmatpush.msrb.mxu0 %v1497_v7  ;;  %755 = vmatpush.msrb.mxu1 %v1509_v11 }
  0x32   :  { %80 = vperm.xlu0 %1573, %v70_v17   ;;  %75 = vperm.xlu1 %1574, %v69_v22  }
  0x33   :  { %1425 = vmatmul.msk.f32.gmra.mxu0 %vm128_vm1, %v1734_v29  ;;  %756 = vmatpush.msrb.mxu1 %v1508_v13 }
  0x34   :  { %1405 = vmatmul.msk.f32.gmra.mxu2 %vm128_vm1, %v1734_v29  ;;  %1433 = vmatmul.msk.f32.gmra.mxu1 %vm128_vm1, %v1726_v27 }
  0x35   :  { %712 = vmatpush.msrb.mxu0 %v1496_v9  ;;  %757 = vmatpush.msrb.mxu1 %v1507_v16 }
  0x37   :  { %758 = vmatpush.msrb.mxu1 %v1506_v18 }
  0x38   :  { %1453 = vmatmul.msk.f32.gmra.mxu3 %vm128_vm1, %v1726_v27 }
  0x3a   :  { %109 = vperm.xlu0 %1573, %v95_v21   ;;  %104 = vperm.xlu1 %1574, %v94_v26  }
  0x3b   :  { %1462 = vmatmul.msk.f32.vlgmr.msra.gmra.mxu0 %vm128_vm1, %v1673_v14 }
  0x3c   :  { %1434 = vmatmul.msk.f32.gmra.mxu1 %vm128_vm1, %v1678_v15  ;;  %1442 = vmatmul.msk.f32.vlgmr.msra.gmra.mxu2 %vm128_vm1, %v1673_v14 }
  0x3d   :  { %1521 = vmatpush.msk.msra.mxu2 %vm141_vm0, %v1520_v12 }
  0x3f   :  { %801 = vmatpush.msra.mxu2 %v1519_v19 }
  0x40   :  { %1454 = vmatmul.msk.f32.gmra.mxu3 %vm128_vm1, %v1678_v15 }
  0x41   :  { %802 = vmatpush.msra.mxu2 %v1518_v20 }
  0x42   :  { %120 = vperm.xlu0 %1573, %v117_v25  }
  0x43   :  { %1463 = vmatmul.msk.f32.gmra.mxu0 %vm128_vm1, %v1726_v27  ;;  %803 = vmatpush.msra.mxu2 %v1517_v23 }
  0x44   :  { %1435 = vmatmul.msk.f32.gmra.mxu1 %vm128_vm1, %v1734_v29  ;;  %1443 = vmatmul.msk.f32.gmra.mxu2 %vm128_vm1, %v1726_v27 }
  0x45   :  { %804 = vmatpush.msra.mxu2 %v1516_v24 }
  0x48   :  { %1455 = vmatmul.msk.f32.gmra.mxu3 %vm128_vm1, %v1734_v29 }
  0x4b   :  { %1464 = vmatmul.msk.f32.gmra.mxu0 %vm128_vm1, %v1678_v15 }
  0x4c   :  { %1444 = vmatmul.msk.f32.gmra.mxu2 %vm128_vm1, %v1678_v15  ;;  %1472 = vmatmul.msk.f32.vlgmr.msra.gmra.mxu1 %vm128_vm1, %v1673_v14 }
  0x50   :  { %1492 = vmatmul.msk.f32.vlgmr.msra.gmra.mxu3 %vm128_vm1, %v1673_v14 }
  0x53   :  { %1465 = vmatmul.msk.f32.gmra.mxu0 %vm128_vm1, %v1734_v29 }
  0x54   :  { %1445 = vmatmul.msk.f32.gmra.mxu2 %vm128_vm1, %v1734_v29  ;;  %1473 = vmatmul.msk.f32.gmra.mxu1 %vm128_vm1, %v1726_v27 }
  0x58   :  { %1493 = vmatmul.msk.f32.gmra.mxu3 %vm128_vm1, %v1726_v27 }
  0x5b   :  { %1502 = vmatmul.msk.f32.vlgmr.msrb.gmra.mxu0 %vm128_vm1, %v1673_v14 }
  0x5c   :  { %1474 = vmatmul.msk.f32.gmra.mxu1 %vm128_vm1, %v1678_v15  ;;  %1482 = vmatmul.msk.f32.vlgmr.msrb.gmra.mxu2 %vm128_vm1, %v1673_v14 }
  0x60   :  { %1494 = vmatmul.msk.f32.gmra.mxu3 %vm128_vm1, %v1678_v15 }
  0x63   :  { %1503 = vmatmul.msk.f32.gmra.mxu0 %vm128_vm1, %v1726_v27 }
  0x64   :  { %1475 = vmatmul.msk.f32.gmra.mxu1 %vm128_vm1, %v1734_v29  ;;  %1483 = vmatmul.msk.f32.gmra.mxu2 %vm128_vm1, %v1726_v27 }
  0x68   :  { %1495 = vmatmul.msk.f32.gmra.mxu3 %vm128_vm1, %v1734_v29 }
  0x6b   :  { %1504 = vmatmul.msk.f32.gmra.mxu0 %vm128_vm1, %v1678_v15 }
  0x6c   :  { %1484 = vmatmul.msk.f32.gmra.mxu2 %vm128_vm1, %v1678_v15  ;;  %1512 = vmatmul.msk.f32.vlgmr.msrb.gmra.mxu1 %vm128_vm1, %v1673_v14 }
  0x73   :  { %1505 = vmatmul.msk.f32.gmra.mxu0 %vm128_vm1, %v1734_v29 }
  0x74   :  { %1485 = vmatmul.msk.f32.gmra.mxu2 %vm128_vm1, %v1734_v29  ;;  %1513 = vmatmul.msk.f32.gmra.mxu1 %vm128_vm1, %v1726_v27 }
  0x7c   :  { %1514 = vmatmul.msk.f32.gmra.mxu1 %vm128_vm1, %v1678_v15  ;;  %1522 = vmatmul.msk.f32.vlgmr.msra.gmra.mxu2 %vm128_vm1, %v1673_v14 }
  0x84   :  { %1515 = vmatmul.msk.f32.gmra.mxu1 %vm128_vm1, %v1734_v29  ;;  %1523 = vmatmul.msk.f32.gmra.mxu2 %vm128_vm1, %v1726_v27  ;;  %v2049_v42 = vpop.permute.xlu1 %56 }
  0x88   :  { %v2031_v28 = vpop.f32.mrf.mxu0 }
  0x89   :  { %v2033_v30 = vpop.f32.mrf.mxu1 }
  0x8c   :  { %1524 = vmatmul.msk.f32.gmra.mxu2 %vm128_vm1, %v1678_v15  ;;  %v2047_v15 = vpop.permute.xlu0 %66  ;;  %v2064_v51 = vpop.permute.xlu1 %51 }
  0x8d   :  { %v209_v25 = vadd.f32 %v2033_v30, %v2064_v51 }
  0x8f   :  { %v2037_v31 = vpop.f32.mrf.mxu2 }
  0x90   :  { %v2039_v32 = vpop.f32.mrf.mxu0 }
  0x91   :  { %v2041_v33 = vpop.f32.mrf.mxu1 }
  0x92   :  { %v212_v22 = vadd.f32 %v2041_v33, %v2049_v42 }
  0x93   :  { %v300_v14 = vpop.f32.mrf.mxu3 }
  0x94   :  { %1525 = vmatmul.msk.f32.gmra.mxu2 %vm128_vm1, %v1734_v29  ;;  %v2053_v46 = vpop.permute.xlu0 %61  ;;  %v301_v7 = vadd.f32 %v300_v14, %v2064_v51  ;;  %v221_v14 = vmax.f32 %v212_v22, 0.0  ;;  %v2179_v22 = vld [vmem:[%s2460_s3 + $0x10] sm:$0xff] }
  0x96   :  { %v312_v16 = vmax.f32 %v301_v7, 0.0 }
  0x97   :  { %v2045_v34 = vpop.f32.mrf.mxu2 }
  0x98   :  { %v346_v27 = vpop.f32.mrf.mxu0  ;;  %v172_v26 = vadd.f32 %v2045_v34, %v2047_v15  ;;  %v166_v34 = vadd.f32 %v2039_v32, %v2049_v42 }
  0x99   :  { %v214_v35 = vpop.f32.mrf.mxu1  ;;  %v2071_v55 = vadd.f32 %v346_v27, %v2064_v51 }
  0x9a   :  { %v215_v17 = vadd.f32 %v214_v35, %v2053_v46  ;;  %v169_v35 = vadd.f32 %v2037_v31, %v2053_v46  ;;  %v177_v30 = vmax.f32 %v172_v26, 0.0 }
  0x9b   :  { %v303_v36 = vpop.f32.mrf.mxu3  ;;  %v358_v61 = vmax.f32 %v2071_v55, 0.0 }
  0x9c   :  { %v304_v1 = vadd.f32 %v303_v36, %v2049_v42  ;;  %v222_v24 = vmax.f32 %v215_v17, 0.0  ;;  %v220_v36 = vmax.f32 %v209_v25, 0.0 }
  0x9e   :  { %v313_v11 = vmax.f32 %v304_v1, 0.0 }
  0x9f   :  { %v254_v37 = vpop.f32.mrf.mxu2 }
  0xa0   :  { %v349_v38 = vpop.f32.mrf.mxu0  ;;  %v255_v8 = vadd.f32 %v254_v37, %v2064_v51  ;;  %v2114_v37 = vld [vmem:[%s2460_s3] sm:$0xff] }
  0xa1   :  { %v217_v39 = vpop.f32.mrf.mxu1  ;;  %v2059_v49 = vadd.f32 %v349_v38, %v2049_v42 }
  0xa2   :  { %v218_v9 = vadd.f32 %v217_v39, %v2047_v15  ;;  %v266_v18 = vmax.f32 %v255_v8, 0.0  ;;  %v176_v39 = vmax.f32 %v169_v35, 0.0 }
  0xa3   :  { %v306_v40 = vpop.f32.mrf.mxu3  ;;  %v359_v56 = vmax.f32 %v2059_v49, 0.0 }
  0xa4   :  { %v307_v58 = vadd.f32 %v306_v40, %v2053_v46  ;;  %v223_v19 = vmax.f32 %v218_v9, 0.0  ;;  %v163_v40 = vadd.f32 %v2031_v28, %v2064_v51 }
  0xa6   :  { %v314_v5 = vmax.f32 %v307_v58, 0.0  ;;  %v174_v32 = vmax.f32 %v163_v40, 0.0  ;;  %v2134_v58 = vld [vmem:[%s2460_s3 + $0x8] sm:$0xff] }
  0xa7   :  { %v257_v41 = vpop.f32.mrf.mxu2 }
  0xa8   :  { %v352_v43 = vpop.f32.mrf.mxu0  ;;  %v258_v3 = vadd.f32 %v257_v41, %v2049_v42  ;;  %v175_v41 = vmax.f32 %v166_v34, 0.0 }
  0xa9   :  { %v2051_v45 = vpop.f32.mrf.mxu1  ;;  %v2056_v29 = vadd.f32 %v352_v43, %v2053_v46 }
  0xaa   :  { %v267_v12 = vmax.f32 %v258_v3, 0.0 }
  0xab   :  { %v309_v44 = vpop.f32.mrf.mxu3  ;;  %v360_v52 = vmax.f32 %v2056_v29, 0.0 }
  0xac   :  { %v310_v57 = vadd.f32 %v309_v44, %v2047_v15 }
  0xae   :  { %v315_v2 = vmax.f32 %v310_v57, 0.0 }
  0xaf   :  { %v260_v47 = vpop.f32.mrf.mxu2 }
  0xb0   :  { %v355_v48 = vpop.f32.mrf.mxu0  ;;  %v261_v62 = vadd.f32 %v260_v47, %v2053_v46 }
  0xb1   :  { %v2062_v50 = vadd.f32 %v355_v48, %v2047_v15  ;;  %v2078_v59 = vpop.f32.mrf.mxu1 }
  0xb2   :  { %v268_v10 = vmax.f32 %v261_v62, 0.0 }
  0xb3   :  { %v361_v53 = vmax.f32 %v2062_v50, 0.0  ;;  %v2068_v54 = vpop.f32.mrf.mxu3 }
  0xb4   :  { %v485_v17 = vadd.f32 %v2068_v54, %v2064_v51 }
  0xb5   :  { %904 = vmatpush.msra.mxu0 %v361_v53 }
  0xb7   :  { %v263_v60 = vpop.f32.mrf.mxu2  ;;  %905 = vmatpush.msra.mxu0 %v360_v52 }
  0xb8   :  { %v264_v63 = vadd.f32 %v263_v60, %v2047_v15  ;;  %v2085_v0 = vpop.f32.mrf.mxu0 }
  0xb9   :  { %906 = vmatpush.msra.mxu0 %v359_v56  ;;  %v2101_v21 = vpop.f32.mrf.mxu1  ;;  %v2138_v28 = vadd.f32 %v2085_v0, %v2064_v51 }
  0xba   :  { %v269_v4 = vmax.f32 %v264_v63, 0.0  ;;  %v399_v26 = vadd.f32 %v2101_v21, %v2053_v46  ;;  %v2198_v21 = vld [vmem:[%s2460_s3 + $0x18] sm:$0xff] }
  0xbb   :  { %907 = vmatpush.msra.mxu0 %v358_v61  ;;  %v2093_v6 = vpop.f32.mrf.mxu3  ;;  %v542_v3 = vmax.f32 %v2138_v28, 0.0 }
  0xbc   :  { %855 = vmatpush.msrb.mxu3 %v269_v4  ;;  %v406_v34 = vmax.f32 %v399_v26, 0.0 }
  0xbd   :  { %908 = vmatpush.msra.mxu0 %v315_v2 }
  0xbe   :  { %856 = vmatpush.msrb.mxu3 %v268_v10 }
  0xbf   :  { %v2098_v13 = vpop.f32.mrf.mxu2  ;;  %909 = vmatpush.msra.mxu0 %v314_v5 }
  0xc0   :  { %857 = vmatpush.msrb.mxu3 %v267_v12  ;;  %v533_v20 = vpop.f32.mrf.mxu0 }
  0xc1   :  { %910 = vmatpush.msra.mxu0 %v313_v11  ;;  %v401_v38 = vpop.f32.mrf.mxu1  ;;  %v2126_v48 = vadd.f32 %v533_v20, %v2049_v42 }
  0xc2   :  { %858 = vmatpush.msrb.mxu3 %v266_v18 }
  0xc3   :  { %911 = vmatpush.msra.mxu0 %v312_v16  ;;  %v490_v23 = vpop.f32.mrf.mxu3  ;;  %v543_v63 = vmax.f32 %v2126_v48, 0.0 }
  0xc4   :  { %859 = vmatpush.msrb.mxu3 %v223_v19  ;;  %v402_v19 = vadd.f32 %v401_v38, %v2047_v15 }
  0xc5   :  { %912 = vmatpush.msra.mxu0 %v269_v4  ;;  %v491_v4 = vadd.f32 %v490_v23, %v2053_v46 }
  0xc6   :  { %860 = vmatpush.msrb.mxu3 %v222_v24  ;;  %v496_v24 = vmax.f32 %v485_v17, 0.0 }
  0xc7   :  { %v441_v27 = vpop.f32.mrf.mxu2  ;;  %913 = vmatpush.msra.mxu0 %v268_v10  ;;  %v488_v10 = vadd.f32 %v2093_v6, %v2049_v42  ;;  %v439_v6 = vadd.f32 %v2098_v13, %v2064_v51 }
  0xc8   :  { %861 = vmatpush.msrb.mxu3 %v221_v14  ;;  %v536_v33 = vpop.f32.mrf.mxu0 }
  0xc9   :  { %914 = vmatpush.msra.mxu0 %v267_v12  ;;  %v2123_v43 = vadd.f32 %v536_v33, %v2053_v46  ;;  %v2147_v1 = vpop.f32.mrf.mxu1  ;;  %v442_v12 = vadd.f32 %v441_v27, %v2049_v42  ;;  %v497_v54 = vmax.f32 %v488_v10, 0.0  ;;  %v450_v14 = vmax.f32 %v439_v6, 0.0 }
  0xca   :  { %862 = vmatpush.msrb.mxu3 %v220_v36  ;;  %v407_v27 = vmax.f32 %v402_v19, 0.0  ;;  %v396_v36 = vadd.f32 %v2078_v59, %v2049_v42 }
  0xcb   :  { %915 = vmatpush.msra.mxu0 %v266_v18  ;;  %v493_v31 = vpop.f32.mrf.mxu3  ;;  %v544_v60 = vmax.f32 %v2123_v43, 0.0  ;;  %v498_v18 = vmax.f32 %v491_v4, 0.0  ;;  %v451_v23 = vmax.f32 %v442_v12, 0.0 }
  0xcc   :  { %863 = vmatpush.msrb.mxu3 %v177_v30  ;;  %1530 = vmatmul.msk.f32.vlgmr.msra.gmra.mxu0 %vm838_vm2, %v2114_v37  ;;  %v494_v2 = vadd.f32 %v493_v31, %v2047_v15  ;;  %v393_v30 = vadd.f32 %v2051_v45, %v2064_v51  ;;  %v405_v59 = vmax.f32 %v396_v36, 0.0 }
  0xce   :  { %864 = vmatpush.msrb.mxu3 %v176_v39  ;;  %v499_v11 = vmax.f32 %v494_v2, 0.0  ;;  %v404_v39 = vmax.f32 %v393_v30, 0.0 }
  0xcf   :  { %v444_v44 = vpop.f32.mrf.mxu2 }
  0xd0   :  { %865 = vmatpush.msrb.mxu3 %v175_v41  ;;  %v539_v47 = vpop.f32.mrf.mxu0  ;;  %v445_v7 = vadd.f32 %v444_v44, %v2053_v46 }
  0xd1   :  { %v2129_v57 = vadd.f32 %v539_v47, %v2047_v15  ;;  %v2183_v25 = vpop.f32.mrf.mxu1 }
  0xd2   :  { %866 = vmatpush.msrb.mxu3 %v174_v32  ;;  %v452_v20 = vmax.f32 %v445_v7, 0.0 }
  0xd3   :  { %v545_v62 = vmax.f32 %v2129_v57, 0.0  ;;  %1526 = vmatmul.msk.f32.vlgmr.msrb.gmra.mxu3 %vm838_vm2, %v2114_v37  ;;  %v2152_v0 = vpop.f32.mrf.mxu3 }
  0xd4   :  { %1531 = vmatmul.msk.f32.gmra.mxu0 %vm838_vm2, %v2134_v58 }
  0xd5   :  { %1002 = vmatpush.msrb.mxu2 %v545_v62 }
  0xd7   :  { %v447_v5 = vpop.f32.mrf.mxu2  ;;  %1003 = vmatpush.msrb.mxu2 %v544_v60 }
  0xd8   :  { %v448_v8 = vadd.f32 %v447_v5, %v2047_v15  ;;  %v2160_v9 = vpop.f32.mrf.mxu0 }
  0xd9   :  { %1004 = vmatpush.msrb.mxu2 %v543_v63  ;;  %v582_v40 = vpop.f32.mrf.mxu1 }
  0xda   :  { %v453_v16 = vmax.f32 %v448_v8, 0.0 }
  0xdb   :  { %1527 = vmatmul.msk.f32.gmra.mxu3 %vm838_vm2, %v2134_v58  ;;  %1005 = vmatpush.msrb.mxu2 %v542_v3  ;;  %v671_v35 = vpop.f32.mrf.mxu3 }
  0xdc   :  { %953 = vmatpush.msra.mxu1 %v453_v16  ;;  %1532 = vmatmul.msk.f32.gmra.mxu0 %vm838_vm2, %v2179_v22 }
  0xdd   :  { %1006 = vmatpush.msrb.mxu2 %v499_v11  ;;  %v672_v11 = vadd.f32 %v671_v35, %v2049_v42  ;;  %v577_v35 = vadd.f32 %v2147_v1, %v2064_v51  ;;  %v71_v1 = vld [vmem:[%s2457_s4 + $0x10] sm:$0xff] }
  0xde   :  { %954 = vmatpush.msra.mxu1 %v452_v20 }
  0xdf   :  { %v2185_v13 = vpop.f32.mrf.mxu2  ;;  %1007 = vmatpush.msrb.mxu2 %v498_v18  ;;  %v669_v18 = vadd.f32 %v2152_v0, %v2064_v51  ;;  %v580_v0 = vadd.f32 %v2183_v25, %v2049_v42  ;;  %v72_v25 = vld [vmem:[%s2457_s4 + $0x18] sm:$0xff] }
  0xe0   :  { %955 = vmatpush.msra.mxu1 %v451_v23  ;;  %v717_v33 = vpop.f32.mrf.mxu0  ;;  %90 = vperm.xlu2 %1575, %v72_v25  }
  0xe1   :  { %1008 = vmatpush.msrb.mxu2 %v497_v54  ;;  %v585_v50 = vpop.f32.mrf.mxu1  ;;  %v589_v36 = vmax.f32 %v580_v0, 0.0 }
  0xe2   :  { %956 = vmatpush.msra.mxu1 %v450_v14 }
  0xe3   :  { %1009 = vmatpush.msrb.mxu2 %v496_v24  ;;  %1528 = vmatmul.msk.f32.gmra.mxu3 %vm838_vm2, %v2179_v22  ;;  %v674_v45 = vpop.f32.mrf.mxu3 }
  0xe4   :  { %957 = vmatpush.msra.mxu1 %v407_v27  ;;  %1533 = vmatmul.msk.f32.gmra.mxu0 %vm838_vm2, %v2198_v21  ;;  %v675_v8 = vadd.f32 %v674_v45, %v2053_v46 }
  0xe5   :  { %1010 = vmatpush.msrb.mxu2 %v453_v16  ;;  %v623_v16 = vadd.f32 %v2185_v13, %v2064_v51  ;;  %v583_v13 = vadd.f32 %v582_v40, %v2053_v46 }
  0xe6   :  { %958 = vmatpush.msra.mxu1 %v406_v34  ;;  %v682_v6 = vmax.f32 %v675_v8, 0.0  ;;  %v2344_v8 = vpop.permute.xlu1 %75 }
  0xe7   :  { %v625_v38 = vpop.f32.mrf.mxu2  ;;  %1011 = vmatpush.msrb.mxu2 %v452_v20  ;;  %v586_v20 = vadd.f32 %v585_v50, %v2047_v15  ;;  %v634_v26 = vmax.f32 %v623_v16, 0.0 }
  0xe8   :  { %959 = vmatpush.msra.mxu1 %v405_v59  ;;  %v720_v31 = vpop.f32.mrf.mxu0  ;;  %v588_v59 = vmax.f32 %v577_v35, 0.0  ;;  %85 = vperm.xlu2 %1575, %v71_v1  }
  0xe9   :  { %1012 = vmatpush.msrb.mxu2 %v451_v23  ;;  %v2213_v47 = vadd.f32 %v720_v31, %v2053_v46  ;;  %v2257_v19 = vpop.f32.mrf.mxu1  ;;  %v681_v23 = vmax.f32 %v672_v11, 0.0  ;;  %v591_v27 = vmax.f32 %v586_v20, 0.0 }
  0xea   :  { %960 = vmatpush.msra.mxu1 %v404_v39 }
  0xeb   :  { %1013 = vmatpush.msrb.mxu2 %v450_v14  ;;  %1529 = vmatmul.msk.f32.gmra.mxu3 %vm838_vm2, %v2198_v21  ;;  %v677_v49 = vpop.f32.mrf.mxu3  ;;  %v728_v55 = vmax.f32 %v2213_v47, 0.0  ;;  %v680_v14 = vmax.f32 %v669_v18, 0.0 }
  0xec   :  { %961 = vmatpush.msra.mxu1 %v361_v53  ;;  %1538 = vmatmul.msk.f32.vlgmr.msrb.gmra.mxu2 %vm838_vm2, %v2114_v37  ;;  %v2221_v53 = vadd.f32 %v717_v33, %v2049_v42  ;;  %v590_v33 = vmax.f32 %v583_v13, 0.0 }
  0xee   :  { %962 = vmatpush.msra.mxu1 %v360_v52  ;;  %v2230_v52 = vadd.f32 %v2160_v9, %v2064_v51  ;;  %v626_v9 = vadd.f32 %v625_v38, %v2049_v42 }
  0xef   :  { %v628_v41 = vpop.f32.mrf.mxu2 }
  0xf0   :  { %963 = vmatpush.msra.mxu1 %v359_v56  ;;  %v723_v44 = vpop.f32.mrf.mxu0  ;;  %v727_v56 = vmax.f32 %v2221_v53, 0.0  ;;  %v629_v4 = vadd.f32 %v628_v41, %v2053_v46  ;;  %v726_v7 = vmax.f32 %v2230_v52, 0.0  ;;  %v635_v54 = vmax.f32 %v626_v9, 0.0 }
  0xf1   :  { %v2216_v32 = vadd.f32 %v723_v44, %v2047_v15  ;;  %v763_v30 = vpop.f32.mrf.mxu1 }
  0xf2   :  { %964 = vmatpush.msra.mxu1 %v358_v61  ;;  %v678_v61 = vadd.f32 %v677_v49, %v2047_v15  ;;  %v636_v17 = vmax.f32 %v629_v4, 0.0  ;;  %v764_v44 = vadd.f32 %v763_v30, %v2049_v42  ;;  %v761_v49 = vadd.f32 %v2257_v19, %v2064_v51 }
  0xf3   :  { %v729_v29 = vmax.f32 %v2216_v32, 0.0  ;;  %1534 = vmatmul.msk.f32.vlgmr.msra.gmra.mxu1 %vm838_vm2, %v2114_v37 }
  0xf4   :  { %1539 = vmatmul.msk.f32.gmra.mxu2 %vm838_vm2, %v2134_v58  ;;  %v683_v12 = vmax.f32 %v678_v61, 0.0 }
  0xf5   :  { %1100 = vmatpush.msrb.mxu0 %v729_v29 }
  0xf7   :  { %v631_v2 = vpop.f32.mrf.mxu2  ;;  %1101 = vmatpush.msrb.mxu0 %v728_v55 }
  0xf8   :  { %v632_v5 = vadd.f32 %v631_v2, %v2047_v15 }
  0xf9   :  { %1102 = vmatpush.msrb.mxu0 %v727_v56  ;;  %v766_v39 = vpop.f32.mrf.mxu1 }
  0xfa   :  { %v637_v10 = vmax.f32 %v632_v5, 0.0  ;;  %v767_v45 = vadd.f32 %v766_v39, %v2053_v46 }
  0xfb   :  { %1535 = vmatmul.msk.f32.gmra.mxu1 %vm838_vm2, %v2134_v58  ;;  %1103 = vmatpush.msrb.mxu0 %v726_v7 }
  0xfc   :  { %1051 = vmatpush.msra.mxu3 %v637_v10  ;;  %1540 = vmatmul.msk.f32.gmra.mxu2 %vm838_vm2, %v2179_v22  ;;  %v774_v61 = vmax.f32 %v767_v45, 0.0 }
  0xfd   :  { %1104 = vmatpush.msrb.mxu0 %v683_v12 }
  0xfe   :  { %1052 = vmatpush.msra.mxu3 %v636_v17 }
  0xff   :  { %v806_v24 = vpop.f32.mrf.mxu2  ;;  %1105 = vmatpush.msrb.mxu0 %v682_v6 }
 0x100   :  { %1053 = vmatpush.msra.mxu3 %v635_v54  ;;  %v807_v28 = vadd.f32 %v806_v24, %v2064_v51  ;;  %v93_v51 = vld [vmem:[%s2458_s6] sm:$0xff] }
 0x101   :  { %1106 = vmatpush.msrb.mxu0 %v681_v23  ;;  %v769_v48 = vpop.f32.mrf.mxu1 }
 0x102   :  { %1054 = vmatpush.msra.mxu3 %v634_v26  ;;  %v818_v41 = vmax.f32 %v807_v28, 0.0 }
 0x103   :  { %1536 = vmatmul.msk.f32.gmra.mxu1 %vm838_vm2, %v2179_v22  ;;  %1107 = vmatpush.msrb.mxu0 %v680_v14 }
 0x104   :  { %1055 = vmatpush.msra.mxu3 %v591_v27  ;;  %1541 = vmatmul.msk.f32.gmra.mxu2 %vm838_vm2, %v2198_v21 }
 0x105   :  { %1108 = vmatpush.msrb.mxu0 %v637_v10 }
 0x106   :  { %1056 = vmatpush.msra.mxu3 %v590_v33 }
 0x107   :  { %v809_v34 = vpop.f32.mrf.mxu2  ;;  %1109 = vmatpush.msrb.mxu0 %v636_v17 }
 0x108   :  { %1057 = vmatpush.msra.mxu3 %v589_v36 }
 0x109   :  { %1110 = vmatpush.msrb.mxu0 %v635_v54 }
 0x10a   :  { %1058 = vmatpush.msra.mxu3 %v588_v59 }
 0x10b   :  { %1537 = vmatmul.msk.f32.gmra.mxu1 %vm838_vm2, %v2198_v21  ;;  %1111 = vmatpush.msrb.mxu0 %v634_v26 }
 0x10c   :  { %1059 = vmatpush.msra.mxu3 %v545_v62  ;;  %1546 = vmatmul.msk.f32.vlgmr.msrb.gmra.mxu0 %vm838_vm2, %v2114_v37  ;;  %v810_v62 = vadd.f32 %v809_v34, %v2049_v42  ;;  %v96_v42 = vld [vmem:[%s2458_s6 + $0x18] sm:$0xff] }
 0x10d   :  { %114 = vperm.xlu2 %1575, %v96_v42  }
 0x10e   :  { %1060 = vmatpush.msra.mxu3 %v544_v60  ;;  %v819_v40 = vmax.f32 %v810_v62, 0.0  ;;  %v2382_v62 = vld [vmem:[%s2461_s5 + $0x8] sm:$0xff] }
 0x10f   :  { %v812_v38 = vpop.f32.mrf.mxu2 }
 0x110   :  { %1061 = vmatpush.msra.mxu3 %v543_v63  ;;  %v813_v57 = vadd.f32 %v812_v38, %v2053_v46  ;;  %v772_v46 = vmax.f32 %v761_v49, 0.0 }
 0x112   :  { %1062 = vmatpush.msra.mxu3 %v542_v3  ;;  %v820_v63 = vmax.f32 %v813_v57, 0.0  ;;  %v770_v3 = vadd.f32 %v769_v48, %v2047_v15 }
 0x113   :  { %1542 = vmatmul.msk.f32.vlgmr.msra.gmra.mxu3 %vm838_vm2, %v2114_v37 }
 0x114   :  { %1547 = vmatmul.msk.f32.gmra.mxu0 %vm838_vm2, %v2134_v58  ;;  %v775_v50 = vmax.f32 %v770_v3, 0.0 }
 0x115   :  { %99 = vperm.xlu2 %1575, %v93_v51  }
 0x117   :  { %v815_v43 = vpop.f32.mrf.mxu2 }
 0x118   :  { %v816_v60 = vadd.f32 %v815_v43, %v2047_v15  ;;  %v773_v15 = vmax.f32 %v764_v44, 0.0  ;;  %v2375_v43 = vld [vmem:[%s2461_s5] sm:$0xff] }
 0x11a   :  { %v821_v31 = vmax.f32 %v816_v60, 0.0 }
 0x11b   :  { %1543 = vmatmul.msk.f32.gmra.mxu3 %vm838_vm2, %v2134_v58 }
 0x11c   :  { %1149 = vmatpush.msrb.mxu1 %v821_v31  ;;  %1548 = vmatmul.msk.f32.gmra.mxu0 %vm838_vm2, %v2179_v22 }
 0x11e   :  { %1150 = vmatpush.msrb.mxu1 %v820_v63 }
 0x120   :  { %1151 = vmatpush.msrb.mxu1 %v819_v40 }
 0x122   :  { %1152 = vmatpush.msrb.mxu1 %v818_v41 }
 0x123   :  { %1544 = vmatmul.msk.f32.gmra.mxu3 %vm838_vm2, %v2179_v22 }
 0x124   :  { %1153 = vmatpush.msrb.mxu1 %v775_v50  ;;  %1549 = vmatmul.msk.f32.gmra.mxu0 %vm838_vm2, %v2198_v21  ;;  %v2400_v50 = vld [vmem:[%s2461_s5 + $0x10] sm:$0xff] }
 0x126   :  { %1154 = vmatpush.msrb.mxu1 %v774_v61 }
 0x128   :  { %1155 = vmatpush.msrb.mxu1 %v773_v15 }
 0x12a   :  { %1156 = vmatpush.msrb.mxu1 %v772_v46 }
 0x12b   :  { %1545 = vmatmul.msk.f32.gmra.mxu3 %vm838_vm2, %v2198_v21 }
 0x12c   :  { %1157 = vmatpush.msrb.mxu1 %v729_v29 }
 0x12e   :  { %1158 = vmatpush.msrb.mxu1 %v728_v55 }
 0x130   :  { %1159 = vmatpush.msrb.mxu1 %v727_v56 }
 0x132   :  { %1160 = vmatpush.msrb.mxu1 %v726_v7 }
 0x133   :  { %1550 = vmatmul.msk.f32.vlgmr.msrb.gmra.mxu1 %vm838_vm2, %v2114_v37 }
 0x13a   :  { %v2332_v52 = vpop.permute.xlu2 %90 }
 0x13b   :  { %1551 = vmatmul.msk.f32.gmra.mxu1 %vm838_vm2, %v2134_v58 }
 0x143   :  { %1552 = vmatmul.msk.f32.gmra.mxu1 %vm838_vm2, %v2179_v22  ;;  %v2334_v22 = vpop.permute.xlu2 %85 }
 0x149   :  { %v917_v37 = vpop.f32.mrf.mxu0 }
 0x14a   :  { %v918_v26 = vadd.f32 %v917_v37, %v2344_v8 }
 0x14b   :  { %1553 = vmatmul.msk.f32.gmra.mxu1 %vm838_vm2, %v2198_v21  ;;  %v2342_v21 = vpop.permute.xlu0 %80 }
 0x14c   :  { %v929_v33 = vmax.f32 %v918_v26, 0.0 }
 0x151   :  { %v920_v53 = vpop.f32.mrf.mxu0 }
 0x152   :  { %v921_v23 = vadd.f32 %v920_v53, %v2342_v21 }
 0x154   :  { %v930_v27 = vmax.f32 %v921_v23, 0.0 }
 0x156   :  { %v868_v47 = vpop.f32.mrf.mxu3 }
 0x157   :  { %v869_v34 = vadd.f32 %v868_v47, %v2344_v8 }
 0x159   :  { %v923_v56 = vpop.f32.mrf.mxu0  ;;  %v880_v39 = vmax.f32 %v869_v34, 0.0 }
 0x15a   :  { %v924_v19 = vadd.f32 %v923_v56, %v2334_v22 }
 0x15c   :  { %v931_v24 = vmax.f32 %v924_v19, 0.0 }
 0x15e   :  { %v871_v29 = vpop.f32.mrf.mxu3 }
 0x15f   :  { %v872_v25 = vadd.f32 %v871_v29, %v2342_v21 }
 0x161   :  { %v926_v12 = vpop.f32.mrf.mxu0  ;;  %v881_v38 = vmax.f32 %v872_v25, 0.0  ;;  %v110_v25 = vpop.permute.xlu0 %109 }
 0x162   :  { %v927_v18 = vadd.f32 %v926_v12, %v2332_v52 }
 0x164   :  { %v932_v54 = vmax.f32 %v927_v18, 0.0 }
 0x166   :  { %v874_v2 = vpop.f32.mrf.mxu3 }
 0x167   :  { %v875_v35 = vadd.f32 %v874_v2, %v2334_v22 }
 0x169   :  { %v882_v30 = vmax.f32 %v875_v35, 0.0 }
 0x16e   :  { %v877_v16 = vpop.f32.mrf.mxu3 }
 0x16f   :  { %v1015_v13 = vpop.f32.mrf.mxu2  ;;  %v878_v14 = vadd.f32 %v877_v16, %v2332_v52 }
 0x170   :  { %v966_v32 = vpop.f32.mrf.mxu1  ;;  %v1016_v29 = vadd.f32 %v1015_v13, %v2344_v8 }
 0x171   :  { %v2352_v17 = vadd.f32 %v966_v32, %v2344_v8  ;;  %v883_v36 = vmax.f32 %v878_v14, 0.0 }
 0x172   :  { %v1027_v56 = vmax.f32 %v1016_v29, 0.0  ;;  %v121_v29 = vpop.permute.xlu0 %120 }
 0x173   :  { %v978_v20 = vmax.f32 %v2352_v17, 0.0 }
 0x177   :  { %v1018_v59 = vpop.f32.mrf.mxu2 }
 0x178   :  { %v969_v58 = vpop.f32.mrf.mxu1  ;;  %v1019_v47 = vadd.f32 %v1018_v59, %v2342_v21 }
 0x179   :  { %v2347_v9 = vadd.f32 %v969_v58, %v2342_v21  ;;  %v43_v58 = vld [vmem:[%s2461_s5 + $0x18] sm:$0xff] }
 0x17b   :  { %v979_v6 = vmax.f32 %v2347_v9, 0.0 }
 0x17f   :  { %v1021_v60 = vpop.f32.mrf.mxu2 }
 0x180   :  { %v972_v55 = vpop.f32.mrf.mxu1  ;;  %v1022_v46 = vadd.f32 %v1021_v60, %v2334_v22 }
 0x181   :  { %v2337_v4 = vadd.f32 %v972_v55, %v2334_v22  ;;  %v1028_v55 = vmax.f32 %v1019_v47, 0.0 }
 0x182   :  { %v1029_v32 = vmax.f32 %v1022_v46, 0.0 }
 0x183   :  { %v980_v11 = vmax.f32 %v2337_v4, 0.0 }
 0x187   :  { %v1024_v40 = vpop.f32.mrf.mxu2 }
 0x188   :  { %v975_v5 = vpop.f32.mrf.mxu1  ;;  %v1025_v61 = vadd.f32 %v1024_v40, %v2332_v52 }
 0x189   :  { %v2340_v7 = vadd.f32 %v975_v5, %v2332_v52  ;;  %v1113_v28 = vpop.f32.mrf.mxu0 }
 0x18a   :  { %v1030_v51 = vmax.f32 %v1025_v61, 0.0 }
 0x18b   :  { %v981_v10 = vmax.f32 %v2340_v7, 0.0 }
 0x18d   :  { %1210 = vmatpush.msra.mxu2 %v981_v10 }
 0x18f   :  { %1211 = vmatpush.msra.mxu2 %v980_v11 }
 0x191   :  { %1212 = vmatpush.msra.mxu2 %v979_v6  ;;  %v1116_v53 = vpop.f32.mrf.mxu0 }
 0x192   :  { %v1117_v17 = vadd.f32 %v1116_v53, %v2342_v21  ;;  %v44_v53 = vld [vmem:[%s2462_s7] sm:$0x3f] }
 0x193   :  { %1213 = vmatpush.msra.mxu2 %v978_v20 }
 0x194   :  { %v1126_v26 = vmax.f32 %v1117_v17, 0.0 }
 0x195   :  { %1214 = vmatpush.msra.mxu2 %v932_v54 }
 0x196   :  { %v1064_v0 = vpop.f32.mrf.mxu3 }
 0x197   :  { %1215 = vmatpush.msra.mxu2 %v931_v24  ;;  %v2403_v49 = vadd.f32 %v1064_v0, %v2344_v8  ;;  %v1114_v24 = vadd.f32 %v1113_v28, %v2344_v8 }
 0x199   :  { %1216 = vmatpush.msra.mxu2 %v930_v27  ;;  %v1076_v42 = vmax.f32 %v2403_v49, 0.0  ;;  %v1119_v5 = vpop.f32.mrf.mxu0  ;;  %v1125_v14 = vmax.f32 %v1114_v24, 0.0 }
 0x19a   :  { %v1120_v23 = vadd.f32 %v1119_v5, %v2334_v22 }
 0x19b   :  { %1217 = vmatpush.msra.mxu2 %v929_v33  ;;  %v115_v33 = vpop.permute.xlu2 %114 }
 0x19c   :  { %v1127_v13 = vmax.f32 %v1120_v23, 0.0 }
 0x19d   :  { %1218 = vmatpush.msra.mxu2 %v883_v36 }
 0x19e   :  { %v1067_v1 = vpop.f32.mrf.mxu3 }
 0x19f   :  { %1219 = vmatpush.msra.mxu2 %v882_v30  ;;  %v2393_v45 = vadd.f32 %v1067_v1, %v2342_v21  ;;  %v105_v1 = vpop.permute.xlu1 %104 }
 0x1a1   :  { %1220 = vmatpush.msra.mxu2 %v881_v38  ;;  %v1077_v15 = vmax.f32 %v2393_v45, 0.0  ;;  %v1122_v19 = vpop.f32.mrf.mxu0 }
 0x1a3   :  { %1221 = vmatpush.msra.mxu2 %v880_v39 }
 0x1a4   :  { %1554 = vmatmul.msk.f32.vlgmr.msra.gmra.mxu2 %vm838_vm2, %v2375_v43 }
 0x1a6   :  { %v1070_v57 = vpop.f32.mrf.mxu3 }
 0x1a7   :  { %v2387_v31 = vadd.f32 %v1070_v57, %v2334_v22  ;;  %v100_v57 = vpop.permute.xlu2 %99 }
 0x1a9   :  { %v1078_v41 = vmax.f32 %v2387_v31, 0.0 }
 0x1ac   :  { %1555 = vmatmul.msk.f32.gmra.mxu2 %vm838_vm2, %v2382_v62 }
 0x1ae   :  { %v1073_v48 = vpop.f32.mrf.mxu3 }
 0x1af   :  { %v2390_v63 = vadd.f32 %v1073_v48, %v2332_v52 }
 0x1b0   :  { %v1162_v3 = vpop.f32.mrf.mxu1 }
 0x1b1   :  { %v1079_v44 = vmax.f32 %v2390_v63, 0.0  ;;  %v1163_v4 = vadd.f32 %v1162_v3, %v2344_v8 }
 0x1b3   :  { %1259 = vmatpush.msrb.mxu3 %v1079_v44  ;;  %v1174_v54 = vmax.f32 %v1163_v4, 0.0 }
 0x1b4   :  { %1556 = vmatmul.msk.f32.gmra.mxu2 %vm838_vm2, %v2400_v50 }
 0x1b5   :  { %1260 = vmatpush.msrb.mxu3 %v1078_v41 }
 0x1b7   :  { %1261 = vmatpush.msrb.mxu3 %v1077_v15 }
 0x1b8   :  { %v1165_v37 = vpop.f32.mrf.mxu1 }
 0x1b9   :  { %1262 = vmatpush.msrb.mxu3 %v1076_v42  ;;  %v1166_v7 = vadd.f32 %v1165_v37, %v2342_v21 }
 0x1bb   :  { %1263 = vmatpush.msrb.mxu3 %v1030_v51  ;;  %v1175_v9 = vmax.f32 %v1166_v7, 0.0 }
 0x1bc   :  { %1557 = vmatmul.msk.f32.gmra.mxu2 %vm838_vm2, %v43_v58 }
 0x1bd   :  { %1264 = vmatpush.msrb.mxu3 %v1029_v32 }
 0x1bf   :  { %1265 = vmatpush.msrb.mxu3 %v1028_v55 }
 0x1c0   :  { %v1168_v2 = vpop.f32.mrf.mxu1 }
 0x1c1   :  { %1266 = vmatpush.msrb.mxu3 %v1027_v56  ;;  %v1169_v16 = vadd.f32 %v1168_v2, %v2334_v22 }
 0x1c3   :  { %1267 = vmatpush.msrb.mxu3 %v981_v10 }
 0x1c5   :  { %1268 = vmatpush.msrb.mxu3 %v980_v11  ;;  %v1176_v11 = vmax.f32 %v1169_v16, 0.0 }
 0x1c7   :  { %1269 = vmatpush.msrb.mxu3 %v979_v6  ;;  %v1123_v6 = vadd.f32 %v1122_v19, %v2332_v52 }
 0x1c8   :  { %v1171_v12 = vpop.f32.mrf.mxu1 }
 0x1c9   :  { %v1172_v18 = vadd.f32 %v1171_v12, %v2332_v52  ;;  %1270 = vmatpush.msrb.mxu3 %v978_v20  ;;  %v1128_v20 = vmax.f32 %v1123_v6, 0.0 }
 0x1ca   :  { %1558 = vmatmul.msk.f32.vlgmr.msrb.gmra.mxu3 %vm838_vm2, %v2375_v43 }
 0x1cb   :  { %v1177_v10 = vmax.f32 %v1172_v18, 0.0 }
 0x1cd   :  { %1308 = vmatpush.msra.mxu0 %v1177_v10 }
 0x1cf   :  { %1309 = vmatpush.msra.mxu0 %v1176_v11 }
 0x1d1   :  { %1310 = vmatpush.msra.mxu0 %v1175_v9 }
 0x1d2   :  { %1559 = vmatmul.msk.f32.gmra.mxu3 %vm838_vm2, %v2382_v62 }
 0x1d3   :  { %1311 = vmatpush.msra.mxu0 %v1174_v54 }
 0x1d5   :  { %1312 = vmatpush.msra.mxu0 %v1128_v20 }
 0x1d7   :  { %1313 = vmatpush.msra.mxu0 %v1127_v13 }
 0x1d9   :  { %1314 = vmatpush.msra.mxu0 %v1126_v26 }
 0x1da   :  { %1560 = vmatmul.msk.f32.gmra.mxu3 %vm838_vm2, %v2400_v50 }
 0x1db   :  { %1315 = vmatpush.msra.mxu0 %v1125_v14 }
 0x1dd   :  { %1316 = vmatpush.msra.mxu0 %v1079_v44 }
 0x1df   :  { %1317 = vmatpush.msra.mxu0 %v1078_v41 }
 0x1e1   :  { %1318 = vmatpush.msra.mxu0 %v1077_v15 }
 0x1e2   :  { %1561 = vmatmul.msk.f32.gmra.mxu3 %vm838_vm2, %v43_v58 }
 0x1e3   :  { %1319 = vmatpush.msra.mxu0 %v1076_v42 }
 0x1e4   :  { %1562 = vmatmul.msk.f32.vlgmr.msra.gmra.mxu0 %vm838_vm2, %v2375_v43 }
 0x1ec   :  { %1563 = vmatmul.msk.f32.gmra.mxu0 %vm838_vm2, %v2382_v62 }
 0x1f4   :  { %1564 = vmatmul.msk.f32.gmra.mxu0 %vm838_vm2, %v2400_v50 }
 0x1fc   :  { %1565 = vmatmul.msk.f32.gmra.mxu0 %vm838_vm2, %v43_v58 }
 0x227   :  { %v1223_v21 = vpop.f32.mrf.mxu2 }
 0x228   :  { %v1224_v37 = vadd.f32 %v1223_v21, %v100_v57 }
 0x22a   :  { %v1235_v58 = vmax.f32 %v1224_v37, 0.0 }
 0x22f   :  { %v1226_v27 = vpop.f32.mrf.mxu2 }
 0x230   :  { %v1227_v42 = vadd.f32 %v1226_v27, %v105_v1 }
 0x232   :  { %v1236_v32 = vmax.f32 %v1227_v42, 0.0 }
 0x237   :  { %v1229_v38 = vpop.f32.mrf.mxu2 }
 0x238   :  { %v1230_v15 = vadd.f32 %v1229_v38, %v110_v25 }
 0x23a   :  { %v1237_v47 = vmax.f32 %v1230_v15, 0.0 }
 0x23f   :  { %v1232_v41 = vpop.f32.mrf.mxu2 }
 0x240   :  { %v1233_v49 = vadd.f32 %v1232_v41, %v115_v33 }
 0x242   :  { %v1238_v51 = vmax.f32 %v1233_v49, 0.0 }
 0x24d   :  { %v1272_v52 = vpop.f32.mrf.mxu3 }
 0x24e   :  { %v1273_v44 = vadd.f32 %v1272_v52, %v100_v57 }
 0x250   :  { %v1284_v46 = vmax.f32 %v1273_v44, 0.0 }
 0x255   :  { %v1275_v8 = vpop.f32.mrf.mxu3 }
 0x256   :  { %v1276_v40 = vadd.f32 %v1275_v8, %v105_v1 }
 0x258   :  { %v1285_v61 = vmax.f32 %v1276_v40, 0.0 }
 0x25d   :  { %v1278_v36 = vpop.f32.mrf.mxu3 }
 0x25e   :  { %v1279_v63 = vadd.f32 %v1278_v36, %v110_v25 }
 0x260   :  { %v1286_v50 = vmax.f32 %v1279_v63, 0.0 }
 0x261   :  { %v1321_v22 = vpop.f32.mrf.mxu0 }
 0x262   :  { %v1322_v62 = vadd.f32 %v1321_v22, %v100_v57 }
 0x264   :  { %v1333_v3 = vmax.f32 %v1322_v62, 0.0 }
 0x265   :  { %v1281_v60 = vpop.f32.mrf.mxu3 }
 0x266   :  { %v1282_v48 = vadd.f32 %v1281_v60, %v115_v33 }
 0x268   :  { %v1287_v45 = vmax.f32 %v1282_v48, 0.0 }
 0x269   :  { %v1324_v0 = vpop.f32.mrf.mxu0 }
 0x26a   :  { %v1325_v39 = vadd.f32 %v1324_v0, %v105_v1 }
 0x26c   :  { %v1334_v28 = vmax.f32 %v1325_v39, 0.0 }
 0x271   :  { %v1327_v35 = vpop.f32.mrf.mxu0 }
 0x272   :  { %v1328_v34 = vadd.f32 %v1327_v35, %v110_v25 }
 0x274   :  { %v1335_v31 = vmax.f32 %v1328_v34, 0.0 }
 0x279   :  { %v1330_v30 = vpop.f32.mrf.mxu0 }
 0x27a   :  { %v1331_v59 = vadd.f32 %v1330_v30, %v115_v33 }
 0x27c   :  { %v1336_v43 = vmax.f32 %v1331_v59, 0.0 }
 0x27e   :  { %1360 = vmatpush.msra.mxu1 %v1336_v43 }
 0x280   :  { %1361 = vmatpush.msra.mxu1 %v1335_v31 }
 0x282   :  { %1362 = vmatpush.msra.mxu1 %v1334_v28 }
 0x284   :  { %1363 = vmatpush.msra.mxu1 %v1333_v3 }
 0x286   :  { %1364 = vmatpush.msra.mxu1 %v1287_v45 }
 0x288   :  { %1365 = vmatpush.msra.mxu1 %v1286_v50 }
 0x28a   :  { %1366 = vmatpush.msra.mxu1 %v1285_v61 }
 0x28c   :  { %1367 = vmatpush.msra.mxu1 %v1284_v46 }
 0x28e   :  { %1368 = vmatpush.msra.mxu1 %v1238_v51 }
 0x290   :  { %1369 = vmatpush.msra.mxu1 %v1237_v47 }
 0x292   :  { %1370 = vmatpush.msra.mxu1 %v1236_v32 }
 0x294   :  { %1371 = vmatpush.msra.mxu1 %v1235_v58 }
 0x295   :  { %1566 = vmatmul.msk.f32.vlgmr.msra.gmra.mxu1 %vm838_vm2, %v44_v53 }
 0x312   :  { %v1373_v55 = vpop.f32.mrf.mxu1 }
 0x313   :  { %v1374_v56 = vadd.f32 %v1373_v55, %v121_v29 }
 0x315   :  { %1376 = vst [vmem:[%s2463_s9] sm:$0x3f] %v1374_v56 }

</bundles_post_ra>
